<compile_context>
chip_gen: v7x
topology: tpu7x:2x2x1
jax: 0.10.0
libtpu: 0.0.40
codegen_flags: <defaults>
</compile_context>

<pallas_src>
import jax
import jax.numpy as jnp
import numpy as np
from jax.experimental import pallas as pl
from jax.experimental.pallas import tpu as pltpu


def _round_up(x, m):
    return (x + m - 1) // m * m


# ----------------------------- Pallas kernel ------------------------------

def make_decoder_kernel(num_layers, S, Bp, E, H, Vp):
    L = num_layers

    def kernel(*refs):
        # input refs:  x, wih_0..wih_{L-1}, whh_0..whh_{L-1}, b_0..b_{L-1},
        #              wlin, blin
        # output refs: out
        # scratch:     seq (S*Bp, H), gates (S*Bp, 4H)
        x_ref = refs[0]                       # (S*Bp, E)
        wih = refs[1:1 + L]                   # each (in_dim, 4H), cols i,f,o,g
        whh = refs[1 + L:1 + 2 * L]           # each (H, 4H),      cols i,f,o,g
        bias = refs[1 + 2 * L:1 + 3 * L]      # each (1, 4H) = b_ih + b_hh
        wlin_ref = refs[1 + 3 * L]            # (H, Vp)
        blin_ref = refs[2 + 3 * L]            # (1, Vp)
        out_ref = refs[3 + 3 * L]             # (S*Bp, Vp)
        seq_ref = refs[4 + 3 * L]             # (S*Bp, H)  layer output seq
        gates_ref = refs[5 + 3 * L]           # (S*Bp, 4H) precomputed x-gates

        for l in range(L):
            # ---- batched input-to-hidden projection for the whole sequence
            layer_in = x_ref[...] if l == 0 else seq_ref[...]
            gates_ref[...] = (
                jnp.dot(layer_in, wih[l][...],
                        preferred_element_type=jnp.float32)
                + bias[l][...]
            )

            # ---- recurrence: only h @ W_hh + elementwise per step
            whh_val = whh[l][...]             # hoisted weight load
            h = jnp.zeros((Bp, H), jnp.float32)
            c = jnp.zeros((Bp, H), jnp.float32)
            for t in range(S):                # fully unrolled, static indices
                g_pre = gates_ref[pl.ds(t * Bp, Bp), :] + jnp.dot(
                    h, whh_val, preferred_element_type=jnp.float32)
                # gate order (wrapper-permuted): i, f, o, g
                sig = jax.nn.sigmoid(g_pre[:, :3 * H])   # one EUP pass
                g_g = jnp.tanh(g_pre[:, 3 * H:])         # one EUP pass
                i_g = sig[:, :H]
                f_g = sig[:, H:2 * H]
                o_g = sig[:, 2 * H:3 * H]
                c = f_g * c + i_g * g_g
                h = o_g * jnp.tanh(c)
                seq_ref[pl.ds(t * Bp, Bp), :] = h

        # ---- single lane-dense vocab projection over the whole sequence
        out_ref[...] = (
            jnp.dot(seq_ref[...], wlin_ref[...],
                    preferred_element_type=jnp.float32)
            + blin_ref[...]
        )

    return kernel


# ------------------------------- Wrapper -----------------------------------

def _permute_gates(w, H):
    """PyTorch gate blocking i,f,g,o (along axis 0) -> i,f,o,g."""
    return jnp.concatenate(
        [w[:H], w[H:2 * H], w[3 * H:4 * H], w[2 * H:3 * H]], axis=0)


def decoder_rnn_forward(features, captions, params, num_layers, hidden_dim):
    """features: (B, E) float32, captions: (T, B) int32 -> (T+1, B, V)."""
    emb_table = params["embedding"]                     # (V, E)
    # TODO(synk): embedding gather stays as plain-JAX glue (data-dependent
    # gather), the rest of the forward runs inside the Pallas kernel.
    embed = jnp.take(emb_table, captions, axis=0)       # (T, B, E)
    x = jnp.concatenate([features[None, :, :], embed], axis=0)
    x = x.astype(jnp.float32)                           # (S, B, E)
    S, B, E = x.shape
    H = hidden_dim
    V = params["w_lin"].shape[0]
    L = num_layers

    Bp = _round_up(max(B, 8), 8)        # pad batch to sublane width
    Vp = _round_up(V, 128)              # pad vocab to lane width (dense vst)

    x_pad = jnp.zeros((S, Bp, E), jnp.float32).at[:, :B, :].set(x)
    x_flat = x_pad.reshape(S * Bp, E)

    wih_list, whh_list, bias_list = [], [], []
    for l in range(L):
        wih_list.append(
            _permute_gates(params[f"w_ih_{l}"].astype(jnp.float32), H).T)
        whh_list.append(
            _permute_gates(params[f"w_hh_{l}"].astype(jnp.float32), H).T)
        b = (params[f"b_ih_{l}"] + params[f"b_hh_{l}"]).astype(jnp.float32)
        bias_list.append(_permute_gates(b, H).reshape(1, 4 * H))

    wlin = jnp.zeros((H, Vp), jnp.float32).at[:, :V].set(
        params["w_lin"].T.astype(jnp.float32))
    blin = jnp.zeros((1, Vp), jnp.float32).at[:, :V].set(
        params["b_lin"].astype(jnp.float32).reshape(1, V))

    inputs = [x_flat] + wih_list + whh_list + bias_list + [wlin, blin]
    vmem = pl.BlockSpec(memory_space=pltpu.MemorySpace.VMEM)

    out_flat = pl.pallas_call(
        make_decoder_kernel(L, S, Bp, E, H, Vp),
        out_shape=jax.ShapeDtypeStruct((S * Bp, Vp), jnp.float32),
        in_specs=[vmem] * len(inputs),
        out_specs=vmem,
        scratch_shapes=[
            pltpu.VMEM((S * Bp, H), jnp.float32),       # layer output sequence
            pltpu.VMEM((S * Bp, 4 * H), jnp.float32),   # precomputed x-gates
        ],
    )(*inputs)

    return out_flat.reshape(S, Bp, Vp)[:, :B, :V]


# --------------------------- Reference (numpy) ------------------------------

def ref_forward(features, captions, params, num_layers, hidden_dim):
    H = hidden_dim
    emb = np.asarray(params["embedding"])[np.asarray(captions)]
    x = np.concatenate([np.asarray(features)[None], emb], axis=0).astype(np.float32)
    S, B, _ = x.shape

    def sigmoid(z):
        return 1.0 / (1.0 + np.exp(-z))

    inp = x
    for l in range(num_layers):
        wih = np.asarray(params[f"w_ih_{l}"]).T
        whh = np.asarray(params[f"w_hh_{l}"]).T
        b = np.asarray(params[f"b_ih_{l}"]) + np.asarray(params[f"b_hh_{l}"])
        h = np.zeros((B, H), np.float32)
        c = np.zeros((B, H), np.float32)
        outs = []
        for t in range(S):
            gates = inp[t] @ wih + h @ whh + b
            i = sigmoid(gates[:, :H])
            f = sigmoid(gates[:, H:2 * H])
            g = np.tanh(gates[:, 2 * H:3 * H])
            o = sigmoid(gates[:, 3 * H:])
            c = f * c + i * g
            h = o * np.tanh(c)
            outs.append(h)
        inp = np.stack(outs, axis=0)
    return inp @ np.asarray(params["w_lin"]).T + np.asarray(params["b_lin"])


# --------------------------------- Main -------------------------------------

if __name__ == "__main__":
    vocab_size = 64
    embedding_dim = 32
    hidden_dim = 32
    num_layers = 2
    T = 8   # caption length
    B = 2   # batch

    key = jax.random.PRNGKey(0)
    keys = jax.random.split(key, 4 + 4 * num_layers + 2)
    ki = iter(keys)

    k_init = 1.0 / np.sqrt(hidden_dim)
    params = {
        "embedding": jax.random.normal(next(ki), (vocab_size, embedding_dim),
                                       jnp.float32) * 0.1,
        "w_lin": jax.random.uniform(next(ki), (vocab_size, hidden_dim),
                                    jnp.float32, -k_init, k_init),
        "b_lin": jax.random.uniform(next(ki), (vocab_size,),
                                    jnp.float32, -k_init, k_init),
    }
    for l in range(num_layers):
        in_dim = embedding_dim if l == 0 else hidden_dim
        params[f"w_ih_{l}"] = jax.random.uniform(
            next(ki), (4 * hidden_dim, in_dim), jnp.float32, -k_init, k_init)
        params[f"w_hh_{l}"] = jax.random.uniform(
            next(ki), (4 * hidden_dim, hidden_dim), jnp.float32, -k_init, k_init)
        params[f"b_ih_{l}"] = jax.random.uniform(
            next(ki), (4 * hidden_dim,), jnp.float32, -k_init, k_init)
        params[f"b_hh_{l}"] = jax.random.uniform(
            next(ki), (4 * hidden_dim,), jnp.float32, -k_init, k_init)

    features = jax.random.normal(next(ki), (B, embedding_dim), jnp.float32)
    captions = jax.random.randint(next(ki), (T, B), 0, vocab_size, jnp.int32)

    out = decoder_rnn_forward(features, captions, params, num_layers, hidden_dim)
    out = jax.block_until_ready(out)

    expected = ref_forward(features, captions, params, num_layers, hidden_dim)
    assert out.shape == (T + 1, B, vocab_size), out.shape
    np.testing.assert_allclose(np.asarray(out), expected, rtol=2e-3, atol=2e-3)

    print("KERNEL_OK")
</pallas_src>

<mosaic_0001>
module attributes {stable_mosaic.version = 11 : i64} {
  func.func @kernel(%arg0: memref<72x32xf32, #tpu.memory_space<vmem>>, %arg1: memref<32x128xf32, #tpu.memory_space<vmem>>, %arg2: memref<32x128xf32, #tpu.memory_space<vmem>>, %arg3: memref<32x128xf32, #tpu.memory_space<vmem>>, %arg4: memref<32x128xf32, #tpu.memory_space<vmem>>, %arg5: memref<1x128xf32, #tpu.memory_space<vmem>>, %arg6: memref<1x128xf32, #tpu.memory_space<vmem>>, %arg7: memref<32x128xf32, #tpu.memory_space<vmem>>, %arg8: memref<1x128xf32, #tpu.memory_space<vmem>>, %arg9: memref<72x128xf32, #tpu.memory_space<vmem>>, %arg10: memref<72x32xf32, #tpu.memory_space<vmem>>, %arg11: memref<72x128xf32, #tpu.memory_space<vmem>>) attributes {dimension_semantics = [], scalar_prefetch = 0 : i64, scratch_operands = 2 : i64, tpu.core_type = #tpu.core_type<tc>} {
    %c0 = arith.constant 0 : index
    %c0_0 = arith.constant 0 : index
    %0 = vector.load %arg0[%c0, %c0_0] : memref<72x32xf32, #tpu.memory_space<vmem>>, vector<72x32xf32>
    %c0_1 = arith.constant 0 : index
    %c0_2 = arith.constant 0 : index
    %1 = vector.load %arg1[%c0_1, %c0_2] : memref<32x128xf32, #tpu.memory_space<vmem>>, vector<32x128xf32>
    %cst = arith.constant dense<0.000000e+00> : vector<72x128xf32>
    %2 = tpu.matmul %0, %1, %cst {dimension_numbers = #tpu.dot_dimension_numbers<[1], [0], [0], [1], [0, 0, 1, 1], [], []>} : vector<72x32xf32>, vector<32x128xf32>, vector<72x128xf32> -> vector<72x128xf32>
    %c0_3 = arith.constant 0 : index
    %c0_4 = arith.constant 0 : index
    %3 = vector.load %arg5[%c0_3, %c0_4] : memref<1x128xf32, #tpu.memory_space<vmem>>, vector<1x128xf32>
    %4 = vector.broadcast %3 : vector<1x128xf32> to vector<72x128xf32>
    %5 = arith.addf %2, %4 : vector<72x128xf32>
    %c0_5 = arith.constant 0 : index
    %c0_6 = arith.constant 0 : index
    %6 = vector.load %arg11[%c0_5, %c0_6] : memref<72x128xf32, #tpu.memory_space<vmem>>, vector<72x128xf32>
    tpu.vector_store %arg11[%c0_5, %c0_6], %5 {strides = array<i32>} : memref<72x128xf32, #tpu.memory_space<vmem>>, vector<72x128xf32>,
    %c0_7 = arith.constant 0 : index
    %c0_8 = arith.constant 0 : index
    %7 = vector.load %arg3[%c0_7, %c0_8] : memref<32x128xf32, #tpu.memory_space<vmem>>, vector<32x128xf32>
    %cst_9 = arith.constant 0.000000e+00 : f32
    %8 = vector.broadcast %cst_9 : f32 to vector<8x32xf32>
    %cst_10 = arith.constant 0.000000e+00 : f32
    %9 = vector.broadcast %cst_10 : f32 to vector<8x32xf32>
    %c0_11 = arith.constant 0 : index
    %c0_12 = arith.constant 0 : index
    %10 = vector.load %arg11[%c0_11, %c0_12] : memref<72x128xf32, #tpu.memory_space<vmem>>, vector<8x128xf32>
    %cst_13 = arith.constant dense<0.000000e+00> : vector<8x128xf32>
    %11 = tpu.matmul %8, %7, %cst_13 {dimension_numbers = #tpu.dot_dimension_numbers<[1], [0], [0], [1], [0, 0, 1, 1], [], []>} : vector<8x32xf32>, vector<32x128xf32>, vector<8x128xf32> -> vector<8x128xf32>
    %12 = arith.addf %10, %11 : vector<8x128xf32>
    %13 = vector.extract_strided_slice %12 {offsets = [0, 0], sizes = [8, 96], strides = [1, 1]} : vector<8x128xf32> to vector<8x96xf32>
    %14 = arith.negf %13 : vector<8x96xf32>
    %15 = math.exp %14 : vector<8x96xf32>
    %cst_14 = arith.constant 1.000000e+00 : f32
    %16 = vector.broadcast %cst_14 : f32 to vector<8x96xf32>
    %17 = arith.addf %16, %15 : vector<8x96xf32>
    %18 = arith.divf %16, %17 : vector<8x96xf32>
    %19 = vector.extract_strided_slice %12 {offsets = [0, 96], sizes = [8, 32], strides = [1, 1]} : vector<8x128xf32> to vector<8x32xf32>
    %20 = math.tanh %19 : vector<8x32xf32>
    %21 = vector.extract_strided_slice %18 {offsets = [0, 0], sizes = [8, 32], strides = [1, 1]} : vector<8x96xf32> to vector<8x32xf32>
    %22 = vector.extract_strided_slice %18 {offsets = [0, 32], sizes = [8, 32], strides = [1, 1]} : vector<8x96xf32> to vector<8x32xf32>
    %23 = vector.extract_strided_slice %18 {offsets = [0, 64], sizes = [8, 32], strides = [1, 1]} : vector<8x96xf32> to vector<8x32xf32>
    %24 = arith.mulf %22, %9 : vector<8x32xf32>
    %25 = arith.mulf %21, %20 : vector<8x32xf32>
    %26 = arith.addf %24, %25 : vector<8x32xf32>
    %27 = math.tanh %26 : vector<8x32xf32>
    %28 = arith.mulf %23, %27 : vector<8x32xf32>
    %c0_15 = arith.constant 0 : index
    %c0_16 = arith.constant 0 : index
    %29 = vector.load %arg10[%c0_15, %c0_16] : memref<72x32xf32, #tpu.memory_space<vmem>>, vector<8x32xf32>
    tpu.vector_store %arg10[%c0_15, %c0_16], %28 {strides = array<i32>} : memref<72x32xf32, #tpu.memory_space<vmem>>, vector<8x32xf32>,
    %c8 = arith.constant 8 : index
    %c0_17 = arith.constant 0 : index
    %30 = vector.load %arg11[%c8, %c0_17] : memref<72x128xf32, #tpu.memory_space<vmem>>, vector<8x128xf32>
    %cst_18 = arith.constant dense<0.000000e+00> : vector<8x128xf32>
    %31 = tpu.matmul %28, %7, %cst_18 {dimension_numbers = #tpu.dot_dimension_numbers<[1], [0], [0], [1], [0, 0, 1, 1], [], []>} : vector<8x32xf32>, vector<32x128xf32>, vector<8x128xf32> -> vector<8x128xf32>
    %32 = arith.addf %30, %31 : vector<8x128xf32>
    %33 = vector.extract_strided_slice %32 {offsets = [0, 0], sizes = [8, 96], strides = [1, 1]} : vector<8x128xf32> to vector<8x96xf32>
    %34 = arith.negf %33 : vector<8x96xf32>
    %35 = math.exp %34 : vector<8x96xf32>
    %cst_19 = arith.constant 1.000000e+00 : f32
    %36 = vector.broadcast %cst_19 : f32 to vector<8x96xf32>
    %37 = arith.addf %36, %35 : vector<8x96xf32>
    %38 = arith.divf %36, %37 : vector<8x96xf32>
    %39 = vector.extract_strided_slice %32 {offsets = [0, 96], sizes = [8, 32], strides = [1, 1]} : vector<8x128xf32> to vector<8x32xf32>
    %40 = math.tanh %39 : vector<8x32xf32>
    %41 = vector.extract_strided_slice %38 {offsets = [0, 0], sizes = [8, 32], strides = [1, 1]} : vector<8x96xf32> to vector<8x32xf32>
    %42 = vector.extract_strided_slice %38 {offsets = [0, 32], sizes = [8, 32], strides = [1, 1]} : vector<8x96xf32> to vector<8x32xf32>
    %43 = vector.extract_strided_slice %38 {offsets = [0, 64], sizes = [8, 32], strides = [1, 1]} : vector<8x96xf32> to vector<8x32xf32>
    %44 = arith.mulf %42, %26 : vector<8x32xf32>
    %45 = arith.mulf %41, %40 : vector<8x32xf32>
    %46 = arith.addf %44, %45 : vector<8x32xf32>
    %47 = math.tanh %46 : vector<8x32xf32>
    %48 = arith.mulf %43, %47 : vector<8x32xf32>
    %c8_20 = arith.constant 8 : index
    %c0_21 = arith.constant 0 : index
    %49 = vector.load %arg10[%c8_20, %c0_21] : memref<72x32xf32, #tpu.memory_space<vmem>>, vector<8x32xf32>
    tpu.vector_store %arg10[%c8_20, %c0_21], %48 {strides = array<i32>} : memref<72x32xf32, #tpu.memory_space<vmem>>, vector<8x32xf32>,
    %c16 = arith.constant 16 : index
    %c0_22 = arith.constant 0 : index
    %50 = vector.load %arg11[%c16, %c0_22] : memref<72x128xf32, #tpu.memory_space<vmem>>, vector<8x128xf32>
    %cst_23 = arith.constant dense<0.000000e+00> : vector<8x128xf32>
    %51 = tpu.matmul %48, %7, %cst_23 {dimension_numbers = #tpu.dot_dimension_numbers<[1], [0], [0], [1], [0, 0, 1, 1], [], []>} : vector<8x32xf32>, vector<32x128xf32>, vector<8x128xf32> -> vector<8x128xf32>
    %52 = arith.addf %50, %51 : vector<8x128xf32>
    %53 = vector.extract_strided_slice %52 {offsets = [0, 0], sizes = [8, 96], strides = [1, 1]} : vector<8x128xf32> to vector<8x96xf32>
    %54 = arith.negf %53 : vector<8x96xf32>
    %55 = math.exp %54 : vector<8x96xf32>
    %cst_24 = arith.constant 1.000000e+00 : f32
    %56 = vector.broadcast %cst_24 : f32 to vector<8x96xf32>
    %57 = arith.addf %56, %55 : vector<8x96xf32>
    %58 = arith.divf %56, %57 : vector<8x96xf32>
    %59 = vector.extract_strided_slice %52 {offsets = [0, 96], sizes = [8, 32], strides = [1, 1]} : vector<8x128xf32> to vector<8x32xf32>
    %60 = math.tanh %59 : vector<8x32xf32>
    %61 = vector.extract_strided_slice %58 {offsets = [0, 0], sizes = [8, 32], strides = [1, 1]} : vector<8x96xf32> to vector<8x32xf32>
    %62 = vector.extract_strided_slice %58 {offsets = [0, 32], sizes = [8, 32], strides = [1, 1]} : vector<8x96xf32> to vector<8x32xf32>
    %63 = vector.extract_strided_slice %58 {offsets = [0, 64], sizes = [8, 32], strides = [1, 1]} : vector<8x96xf32> to vector<8x32xf32>
    %64 = arith.mulf %62, %46 : vector<8x32xf32>
    %65 = arith.mulf %61, %60 : vector<8x32xf32>
    %66 = arith.addf %64, %65 : vector<8x32xf32>
    %67 = math.tanh %66 : vector<8x32xf32>
    %68 = arith.mulf %63, %67 : vector<8x32xf32>
    %c16_25 = arith.constant 16 : index
    %c0_26 = arith.constant 0 : index
    %69 = vector.load %arg10[%c16_25, %c0_26] : memref<72x32xf32, #tpu.memory_space<vmem>>, vector<8x32xf32>
    tpu.vector_store %arg10[%c16_25, %c0_26], %68 {strides = array<i32>} : memref<72x32xf32, #tpu.memory_space<vmem>>, vector<8x32xf32>,
    %c24 = arith.constant 24 : index
    %c0_27 = arith.constant 0 : index
    %70 = vector.load %arg11[%c24, %c0_27] : memref<72x128xf32, #tpu.memory_space<vmem>>, vector<8x128xf32>
    %cst_28 = arith.constant dense<0.000000e+00> : vector<8x128xf32>
    %71 = tpu.matmul %68, %7, %cst_28 {dimension_numbers = #tpu.dot_dimension_numbers<[1], [0], [0], [1], [0, 0, 1, 1], [], []>} : vector<8x32xf32>, vector<32x128xf32>, vector<8x128xf32> -> vector<8x128xf32>
    %72 = arith.addf %70, %71 : vector<8x128xf32>
    %73 = vector.extract_strided_slice %72 {offsets = [0, 0], sizes = [8, 96], strides = [1, 1]} : vector<8x128xf32> to vector<8x96xf32>
    %74 = arith.negf %73 : vector<8x96xf32>
    %75 = math.exp %74 : vector<8x96xf32>
    %cst_29 = arith.constant 1.000000e+00 : f32
    %76 = vector.broadcast %cst_29 : f32 to vector<8x96xf32>
    %77 = arith.addf %76, %75 : vector<8x96xf32>
    %78 = arith.divf %76, %77 : vector<8x96xf32>
    %79 = vector.extract_strided_slice %72 {offsets = [0, 96], sizes = [8, 32], strides = [1, 1]} : vector<8x128xf32> to vector<8x32xf32>
    %80 = math.tanh %79 : vector<8x32xf32>
    %81 = vector.extract_strided_slice %78 {offsets = [0, 0], sizes = [8, 32], strides = [1, 1]} : vector<8x96xf32> to vector<8x32xf32>
    %82 = vector.extract_strided_slice %78 {offsets = [0, 32], sizes = [8, 32], strides = [1, 1]} : vector<8x96xf32> to vector<8x32xf32>
    %83 = vector.extract_strided_slice %78 {offsets = [0, 64], sizes = [8, 32], strides = [1, 1]} : vector<8x96xf32> to vector<8x32xf32>
    %84 = arith.mulf %82, %66 : vector<8x32xf32>
    %85 = arith.mulf %81, %80 : vector<8x32xf32>
    %86 = arith.addf %84, %85 : vector<8x32xf32>
    %87 = math.tanh %86 : vector<8x32xf32>
    %88 = arith.mulf %83, %87 : vector<8x32xf32>
    %c24_30 = arith.constant 24 : index
    %c0_31 = arith.constant 0 : index
    %89 = vector.load %arg10[%c24_30, %c0_31] : memref<72x32xf32, #tpu.memory_space<vmem>>, vector<8x32xf32>
    tpu.vector_store %arg10[%c24_30, %c0_31], %88 {strides = array<i32>} : memref<72x32xf32, #tpu.memory_space<vmem>>, vector<8x32xf32>,
    %c32 = arith.constant 32 : index
    %c0_32 = arith.constant 0 : index
    %90 = vector.load %arg11[%c32, %c0_32] : memref<72x128xf32, #tpu.memory_space<vmem>>, vector<8x128xf32>
    %cst_33 = arith.constant dense<0.000000e+00> : vector<8x128xf32>
    %91 = tpu.matmul %88, %7, %cst_33 {dimension_numbers = #tpu.dot_dimension_numbers<[1], [0], [0], [1], [0, 0, 1, 1], [], []>} : vector<8x32xf32>, vector<32x128xf32>, vector<8x128xf32> -> vector<8x128xf32>
    %92 = arith.addf %90, %91 : vector<8x128xf32>
    %93 = vector.extract_strided_slice %92 {offsets = [0, 0], sizes = [8, 96], strides = [1, 1]} : vector<8x128xf32> to vector<8x96xf32>
    %94 = arith.negf %93 : vector<8x96xf32>
    %95 = math.exp %94 : vector<8x96xf32>
    %cst_34 = arith.constant 1.000000e+00 : f32
    %96 = vector.broadcast %cst_34 : f32 to vector<8x96xf32>
    %97 = arith.addf %96, %95 : vector<8x96xf32>
    %98 = arith.divf %96, %97 : vector<8x96xf32>
    %99 = vector.extract_strided_slice %92 {offsets = [0, 96], sizes = [8, 32], strides = [1, 1]} : vector<8x128xf32> to vector<8x32xf32>
    %100 = math.tanh %99 : vector<8x32xf32>
    %101 = vector.extract_strided_slice %98 {offsets = [0, 0], sizes = [8, 32], strides = [1, 1]} : vector<8x96xf32> to vector<8x32xf32>
    %102 = vector.extract_strided_slice %98 {offsets = [0, 32], sizes = [8, 32], strides = [1, 1]} : vector<8x96xf32> to vector<8x32xf32>
    %103 = vector.extract_strided_slice %98 {offsets = [0, 64], sizes = [8, 32], strides = [1, 1]} : vector<8x96xf32> to vector<8x32xf32>
    %104 = arith.mulf %102, %86 : vector<8x32xf32>
    %105 = arith.mulf %101, %100 : vector<8x32xf32>
    %106 = arith.addf %104, %105 : vector<8x32xf32>
    %107 = math.tanh %106 : vector<8x32xf32>
    %108 = arith.mulf %103, %107 : vector<8x32xf32>
    %c32_35 = arith.constant 32 : index
    %c0_36 = arith.constant 0 : index
    %109 = vector.load %arg10[%c32_35, %c0_36] : memref<72x32xf32, #tpu.memory_space<vmem>>, vector<8x32xf32>
    tpu.vector_store %arg10[%c32_35, %c0_36], %108 {strides = array<i32>} : memref<72x32xf32, #tpu.memory_space<vmem>>, vector<8x32xf32>,
    %c40 = arith.constant 40 : index
    %c0_37 = arith.constant 0 : index
    %110 = vector.load %arg11[%c40, %c0_37] : memref<72x128xf32, #tpu.memory_space<vmem>>, vector<8x128xf32>
    %cst_38 = arith.constant dense<0.000000e+00> : vector<8x128xf32>
    %111 = tpu.matmul %108, %7, %cst_38 {dimension_numbers = #tpu.dot_dimension_numbers<[1], [0], [0], [1], [0, 0, 1, 1], [], []>} : vector<8x32xf32>, vector<32x128xf32>, vector<8x128xf32> -> vector<8x128xf32>
    %112 = arith.addf %110, %111 : vector<8x128xf32>
    %113 = vector.extract_strided_slice %112 {offsets = [0, 0], sizes = [8, 96], strides = [1, 1]} : vector<8x128xf32> to vector<8x96xf32>
    %114 = arith.negf %113 : vector<8x96xf32>
    %115 = math.exp %114 : vector<8x96xf32>
    %cst_39 = arith.constant 1.000000e+00 : f32
    %116 = vector.broadcast %cst_39 : f32 to vector<8x96xf32>
    %117 = arith.addf %116, %115 : vector<8x96xf32>
    %118 = arith.divf %116, %117 : vector<8x96xf32>
    %119 = vector.extract_strided_slice %112 {offsets = [0, 96], sizes = [8, 32], strides = [1, 1]} : vector<8x128xf32> to vector<8x32xf32>
    %120 = math.tanh %119 : vector<8x32xf32>
    %121 = vector.extract_strided_slice %118 {offsets = [0, 0], sizes = [8, 32], strides = [1, 1]} : vector<8x96xf32> to vector<8x32xf32>
    %122 = vector.extract_strided_slice %118 {offsets = [0, 32], sizes = [8, 32], strides = [1, 1]} : vector<8x96xf32> to vector<8x32xf32>
    %123 = vector.extract_strided_slice %118 {offsets = [0, 64], sizes = [8, 32], strides = [1, 1]} : vector<8x96xf32> to vector<8x32xf32>
    %124 = arith.mulf %122, %106 : vector<8x32xf32>
    %125 = arith.mulf %121, %120 : vector<8x32xf32>
    %126 = arith.addf %124, %125 : vector<8x32xf32>
    %127 = math.tanh %126 : vector<8x32xf32>
    %128 = arith.mulf %123, %127 : vector<8x32xf32>
    %c40_40 = arith.constant 40 : index
    %c0_41 = arith.constant 0 : index
    %129 = vector.load %arg10[%c40_40, %c0_41] : memref<72x32xf32, #tpu.memory_space<vmem>>, vector<8x32xf32>
    tpu.vector_store %arg10[%c40_40, %c0_41], %128 {strides = array<i32>} : memref<72x32xf32, #tpu.memory_space<vmem>>, vector<8x32xf32>,
    %c48 = arith.constant 48 : index
    %c0_42 = arith.constant 0 : index
    %130 = vector.load %arg11[%c48, %c0_42] : memref<72x128xf32, #tpu.memory_space<vmem>>, vector<8x128xf32>
    %cst_43 = arith.constant dense<0.000000e+00> : vector<8x128xf32>
    %131 = tpu.matmul %128, %7, %cst_43 {dimension_numbers = #tpu.dot_dimension_numbers<[1], [0], [0], [1], [0, 0, 1, 1], [], []>} : vector<8x32xf32>, vector<32x128xf32>, vector<8x128xf32> -> vector<8x128xf32>
    %132 = arith.addf %130, %131 : vector<8x128xf32>
    %133 = vector.extract_strided_slice %132 {offsets = [0, 0], sizes = [8, 96], strides = [1, 1]} : vector<8x128xf32> to vector<8x96xf32>
    %134 = arith.negf %133 : vector<8x96xf32>
    %135 = math.exp %134 : vector<8x96xf32>
    %cst_44 = arith.constant 1.000000e+00 : f32
    %136 = vector.broadcast %cst_44 : f32 to vector<8x96xf32>
    %137 = arith.addf %136, %135 : vector<8x96xf32>
    %138 = arith.divf %136, %137 : vector<8x96xf32>
    %139 = vector.extract_strided_slice %132 {offsets = [0, 96], sizes = [8, 32], strides = [1, 1]} : vector<8x128xf32> to vector<8x32xf32>
    %140 = math.tanh %139 : vector<8x32xf32>
    %141 = vector.extract_strided_slice %138 {offsets = [0, 0], sizes = [8, 32], strides = [1, 1]} : vector<8x96xf32> to vector<8x32xf32>
    %142 = vector.extract_strided_slice %138 {offsets = [0, 32], sizes = [8, 32], strides = [1, 1]} : vector<8x96xf32> to vector<8x32xf32>
    %143 = vector.extract_strided_slice %138 {offsets = [0, 64], sizes = [8, 32], strides = [1, 1]} : vector<8x96xf32> to vector<8x32xf32>
    %144 = arith.mulf %142, %126 : vector<8x32xf32>
    %145 = arith.mulf %141, %140 : vector<8x32xf32>
    %146 = arith.addf %144, %145 : vector<8x32xf32>
    %147 = math.tanh %146 : vector<8x32xf32>
    %148 = arith.mulf %143, %147 : vector<8x32xf32>
    %c48_45 = arith.constant 48 : index
    %c0_46 = arith.constant 0 : index
    %149 = vector.load %arg10[%c48_45, %c0_46] : memref<72x32xf32, #tpu.memory_space<vmem>>, vector<8x32xf32>
    tpu.vector_store %arg10[%c48_45, %c0_46], %148 {strides = array<i32>} : memref<72x32xf32, #tpu.memory_space<vmem>>, vector<8x32xf32>,
    %c56 = arith.constant 56 : index
    %c0_47 = arith.constant 0 : index
    %150 = vector.load %arg11[%c56, %c0_47] : memref<72x128xf32, #tpu.memory_space<vmem>>, vector<8x128xf32>
    %cst_48 = arith.constant dense<0.000000e+00> : vector<8x128xf32>
    %151 = tpu.matmul %148, %7, %cst_48 {dimension_numbers = #tpu.dot_dimension_numbers<[1], [0], [0], [1], [0, 0, 1, 1], [], []>} : vector<8x32xf32>, vector<32x128xf32>, vector<8x128xf32> -> vector<8x128xf32>
    %152 = arith.addf %150, %151 : vector<8x128xf32>
    %153 = vector.extract_strided_slice %152 {offsets = [0, 0], sizes = [8, 96], strides = [1, 1]} : vector<8x128xf32> to vector<8x96xf32>
    %154 = arith.negf %153 : vector<8x96xf32>
    %155 = math.exp %154 : vector<8x96xf32>
    %cst_49 = arith.constant 1.000000e+00 : f32
    %156 = vector.broadcast %cst_49 : f32 to vector<8x96xf32>
    %157 = arith.addf %156, %155 : vector<8x96xf32>
    %158 = arith.divf %156, %157 : vector<8x96xf32>
    %159 = vector.extract_strided_slice %152 {offsets = [0, 96], sizes = [8, 32], strides = [1, 1]} : vector<8x128xf32> to vector<8x32xf32>
    %160 = math.tanh %159 : vector<8x32xf32>
    %161 = vector.extract_strided_slice %158 {offsets = [0, 0], sizes = [8, 32], strides = [1, 1]} : vector<8x96xf32> to vector<8x32xf32>
    %162 = vector.extract_strided_slice %158 {offsets = [0, 32], sizes = [8, 32], strides = [1, 1]} : vector<8x96xf32> to vector<8x32xf32>
    %163 = vector.extract_strided_slice %158 {offsets = [0, 64], sizes = [8, 32], strides = [1, 1]} : vector<8x96xf32> to vector<8x32xf32>
    %164 = arith.mulf %162, %146 : vector<8x32xf32>
    %165 = arith.mulf %161, %160 : vector<8x32xf32>
    %166 = arith.addf %164, %165 : vector<8x32xf32>
    %167 = math.tanh %166 : vector<8x32xf32>
    %168 = arith.mulf %163, %167 : vector<8x32xf32>
    %c56_50 = arith.constant 56 : index
    %c0_51 = arith.constant 0 : index
    %169 = vector.load %arg10[%c56_50, %c0_51] : memref<72x32xf32, #tpu.memory_space<vmem>>, vector<8x32xf32>
    tpu.vector_store %arg10[%c56_50, %c0_51], %168 {strides = array<i32>} : memref<72x32xf32, #tpu.memory_space<vmem>>, vector<8x32xf32>,
    %c64 = arith.constant 64 : index
    %c0_52 = arith.constant 0 : index
    %170 = vector.load %arg11[%c64, %c0_52] : memref<72x128xf32, #tpu.memory_space<vmem>>, vector<8x128xf32>
    %cst_53 = arith.constant dense<0.000000e+00> : vector<8x128xf32>
    %171 = tpu.matmul %168, %7, %cst_53 {dimension_numbers = #tpu.dot_dimension_numbers<[1], [0], [0], [1], [0, 0, 1, 1], [], []>} : vector<8x32xf32>, vector<32x128xf32>, vector<8x128xf32> -> vector<8x128xf32>
    %172 = arith.addf %170, %171 : vector<8x128xf32>
    %173 = vector.extract_strided_slice %172 {offsets = [0, 0], sizes = [8, 96], strides = [1, 1]} : vector<8x128xf32> to vector<8x96xf32>
    %174 = arith.negf %173 : vector<8x96xf32>
    %175 = math.exp %174 : vector<8x96xf32>
    %cst_54 = arith.constant 1.000000e+00 : f32
    %176 = vector.broadcast %cst_54 : f32 to vector<8x96xf32>
    %177 = arith.addf %176, %175 : vector<8x96xf32>
    %178 = arith.divf %176, %177 : vector<8x96xf32>
    %179 = vector.extract_strided_slice %172 {offsets = [0, 96], sizes = [8, 32], strides = [1, 1]} : vector<8x128xf32> to vector<8x32xf32>
    %180 = math.tanh %179 : vector<8x32xf32>
    %181 = vector.extract_strided_slice %178 {offsets = [0, 0], sizes = [8, 32], strides = [1, 1]} : vector<8x96xf32> to vector<8x32xf32>
    %182 = vector.extract_strided_slice %178 {offsets = [0, 32], sizes = [8, 32], strides = [1, 1]} : vector<8x96xf32> to vector<8x32xf32>
    %183 = vector.extract_strided_slice %178 {offsets = [0, 64], sizes = [8, 32], strides = [1, 1]} : vector<8x96xf32> to vector<8x32xf32>
    %184 = arith.mulf %182, %166 : vector<8x32xf32>
    %185 = arith.mulf %181, %180 : vector<8x32xf32>
    %186 = arith.addf %184, %185 : vector<8x32xf32>
    %187 = math.tanh %186 : vector<8x32xf32>
    %188 = arith.mulf %183, %187 : vector<8x32xf32>
    %c64_55 = arith.constant 64 : index
    %c0_56 = arith.constant 0 : index
    %189 = vector.load %arg10[%c64_55, %c0_56] : memref<72x32xf32, #tpu.memory_space<vmem>>, vector<8x32xf32>
    tpu.vector_store %arg10[%c64_55, %c0_56], %188 {strides = array<i32>} : memref<72x32xf32, #tpu.memory_space<vmem>>, vector<8x32xf32>,
    %c0_57 = arith.constant 0 : index
    %c0_58 = arith.constant 0 : index
    %190 = vector.load %arg10[%c0_57, %c0_58] : memref<72x32xf32, #tpu.memory_space<vmem>>, vector<72x32xf32>
    %c0_59 = arith.constant 0 : index
    %c0_60 = arith.constant 0 : index
    %191 = vector.load %arg2[%c0_59, %c0_60] : memref<32x128xf32, #tpu.memory_space<vmem>>, vector<32x128xf32>
    %cst_61 = arith.constant dense<0.000000e+00> : vector<72x128xf32>
    %192 = tpu.matmul %190, %191, %cst_61 {dimension_numbers = #tpu.dot_dimension_numbers<[1], [0], [0], [1], [0, 0, 1, 1], [], []>} : vector<72x32xf32>, vector<32x128xf32>, vector<72x128xf32> -> vector<72x128xf32>
    %c0_62 = arith.constant 0 : index
    %c0_63 = arith.constant 0 : index
    %193 = vector.load %arg6[%c0_62, %c0_63] : memref<1x128xf32, #tpu.memory_space<vmem>>, vector<1x128xf32>
    %194 = vector.broadcast %193 : vector<1x128xf32> to vector<72x128xf32>
    %195 = arith.addf %192, %194 : vector<72x128xf32>
    %c0_64 = arith.constant 0 : index
    %c0_65 = arith.constant 0 : index
    %196 = vector.load %arg11[%c0_64, %c0_65] : memref<72x128xf32, #tpu.memory_space<vmem>>, vector<72x128xf32>
    tpu.vector_store %arg11[%c0_64, %c0_65], %195 {strides = array<i32>} : memref<72x128xf32, #tpu.memory_space<vmem>>, vector<72x128xf32>,
    %c0_66 = arith.constant 0 : index
    %c0_67 = arith.constant 0 : index
    %197 = vector.load %arg4[%c0_66, %c0_67] : memref<32x128xf32, #tpu.memory_space<vmem>>, vector<32x128xf32>
    %cst_68 = arith.constant 0.000000e+00 : f32
    %198 = vector.broadcast %cst_68 : f32 to vector<8x32xf32>
    %cst_69 = arith.constant 0.000000e+00 : f32
    %199 = vector.broadcast %cst_69 : f32 to vector<8x32xf32>
    %c0_70 = arith.constant 0 : index
    %c0_71 = arith.constant 0 : index
    %200 = vector.load %arg11[%c0_70, %c0_71] : memref<72x128xf32, #tpu.memory_space<vmem>>, vector<8x128xf32>
    %cst_72 = arith.constant dense<0.000000e+00> : vector<8x128xf32>
    %201 = tpu.matmul %198, %197, %cst_72 {dimension_numbers = #tpu.dot_dimension_numbers<[1], [0], [0], [1], [0, 0, 1, 1], [], []>} : vector<8x32xf32>, vector<32x128xf32>, vector<8x128xf32> -> vector<8x128xf32>
    %202 = arith.addf %200, %201 : vector<8x128xf32>
    %203 = vector.extract_strided_slice %202 {offsets = [0, 0], sizes = [8, 96], strides = [1, 1]} : vector<8x128xf32> to vector<8x96xf32>
    %204 = arith.negf %203 : vector<8x96xf32>
    %205 = math.exp %204 : vector<8x96xf32>
    %cst_73 = arith.constant 1.000000e+00 : f32
    %206 = vector.broadcast %cst_73 : f32 to vector<8x96xf32>
    %207 = arith.addf %206, %205 : vector<8x96xf32>
    %208 = arith.divf %206, %207 : vector<8x96xf32>
    %209 = vector.extract_strided_slice %202 {offsets = [0, 96], sizes = [8, 32], strides = [1, 1]} : vector<8x128xf32> to vector<8x32xf32>
    %210 = math.tanh %209 : vector<8x32xf32>
    %211 = vector.extract_strided_slice %208 {offsets = [0, 0], sizes = [8, 32], strides = [1, 1]} : vector<8x96xf32> to vector<8x32xf32>
    %212 = vector.extract_strided_slice %208 {offsets = [0, 32], sizes = [8, 32], strides = [1, 1]} : vector<8x96xf32> to vector<8x32xf32>
    %213 = vector.extract_strided_slice %208 {offsets = [0, 64], sizes = [8, 32], strides = [1, 1]} : vector<8x96xf32> to vector<8x32xf32>
    %214 = arith.mulf %212, %199 : vector<8x32xf32>
    %215 = arith.mulf %211, %210 : vector<8x32xf32>
    %216 = arith.addf %214, %215 : vector<8x32xf32>
    %217 = math.tanh %216 : vector<8x32xf32>
    %218 = arith.mulf %213, %217 : vector<8x32xf32>
    %c0_74 = arith.constant 0 : index
    %c0_75 = arith.constant 0 : index
    %219 = vector.load %arg10[%c0_74, %c0_75] : memref<72x32xf32, #tpu.memory_space<vmem>>, vector<8x32xf32>
    tpu.vector_store %arg10[%c0_74, %c0_75], %218 {strides = array<i32>} : memref<72x32xf32, #tpu.memory_space<vmem>>, vector<8x32xf32>,
    %c8_76 = arith.constant 8 : index
    %c0_77 = arith.constant 0 : index
    %220 = vector.load %arg11[%c8_76, %c0_77] : memref<72x128xf32, #tpu.memory_space<vmem>>, vector<8x128xf32>
    %cst_78 = arith.constant dense<0.000000e+00> : vector<8x128xf32>
    %221 = tpu.matmul %218, %197, %cst_78 {dimension_numbers = #tpu.dot_dimension_numbers<[1], [0], [0], [1], [0, 0, 1, 1], [], []>} : vector<8x32xf32>, vector<32x128xf32>, vector<8x128xf32> -> vector<8x128xf32>
    %222 = arith.addf %220, %221 : vector<8x128xf32>
    %223 = vector.extract_strided_slice %222 {offsets = [0, 0], sizes = [8, 96], strides = [1, 1]} : vector<8x128xf32> to vector<8x96xf32>
    %224 = arith.negf %223 : vector<8x96xf32>
    %225 = math.exp %224 : vector<8x96xf32>
    %cst_79 = arith.constant 1.000000e+00 : f32
    %226 = vector.broadcast %cst_79 : f32 to vector<8x96xf32>
    %227 = arith.addf %226, %225 : vector<8x96xf32>
    %228 = arith.divf %226, %227 : vector<8x96xf32>
    %229 = vector.extract_strided_slice %222 {offsets = [0, 96], sizes = [8, 32], strides = [1, 1]} : vector<8x128xf32> to vector<8x32xf32>
    %230 = math.tanh %229 : vector<8x32xf32>
    %231 = vector.extract_strided_slice %228 {offsets = [0, 0], sizes = [8, 32], strides = [1, 1]} : vector<8x96xf32> to vector<8x32xf32>
    %232 = vector.extract_strided_slice %228 {offsets = [0, 32], sizes = [8, 32], strides = [1, 1]} : vector<8x96xf32> to vector<8x32xf32>
    %233 = vector.extract_strided_slice %228 {offsets = [0, 64], sizes = [8, 32], strides = [1, 1]} : vector<8x96xf32> to vector<8x32xf32>
    %234 = arith.mulf %232, %216 : vector<8x32xf32>
    %235 = arith.mulf %231, %230 : vector<8x32xf32>
    %236 = arith.addf %234, %235 : vector<8x32xf32>
    %237 = math.tanh %236 : vector<8x32xf32>
    %238 = arith.mulf %233, %237 : vector<8x32xf32>
    %c8_80 = arith.constant 8 : index
    %c0_81 = arith.constant 0 : index
    %239 = vector.load %arg10[%c8_80, %c0_81] : memref<72x32xf32, #tpu.memory_space<vmem>>, vector<8x32xf32>
    tpu.vector_store %arg10[%c8_80, %c0_81], %238 {strides = array<i32>} : memref<72x32xf32, #tpu.memory_space<vmem>>, vector<8x32xf32>,
    %c16_82 = arith.constant 16 : index
    %c0_83 = arith.constant 0 : index
    %240 = vector.load %arg11[%c16_82, %c0_83] : memref<72x128xf32, #tpu.memory_space<vmem>>, vector<8x128xf32>
    %cst_84 = arith.constant dense<0.000000e+00> : vector<8x128xf32>
    %241 = tpu.matmul %238, %197, %cst_84 {dimension_numbers = #tpu.dot_dimension_numbers<[1], [0], [0], [1], [0, 0, 1, 1], [], []>} : vector<8x32xf32>, vector<32x128xf32>, vector<8x128xf32> -> vector<8x128xf32>
    %242 = arith.addf %240, %241 : vector<8x128xf32>
    %243 = vector.extract_strided_slice %242 {offsets = [0, 0], sizes = [8, 96], strides = [1, 1]} : vector<8x128xf32> to vector<8x96xf32>
    %244 = arith.negf %243 : vector<8x96xf32>
    %245 = math.exp %244 : vector<8x96xf32>
    %cst_85 = arith.constant 1.000000e+00 : f32
    %246 = vector.broadcast %cst_85 : f32 to vector<8x96xf32>
    %247 = arith.addf %246, %245 : vector<8x96xf32>
    %248 = arith.divf %246, %247 : vector<8x96xf32>
    %249 = vector.extract_strided_slice %242 {offsets = [0, 96], sizes = [8, 32], strides = [1, 1]} : vector<8x128xf32> to vector<8x32xf32>
    %250 = math.tanh %249 : vector<8x32xf32>
    %251 = vector.extract_strided_slice %248 {offsets = [0, 0], sizes = [8, 32], strides = [1, 1]} : vector<8x96xf32> to vector<8x32xf32>
    %252 = vector.extract_strided_slice %248 {offsets = [0, 32], sizes = [8, 32], strides = [1, 1]} : vector<8x96xf32> to vector<8x32xf32>
    %253 = vector.extract_strided_slice %248 {offsets = [0, 64], sizes = [8, 32], strides = [1, 1]} : vector<8x96xf32> to vector<8x32xf32>
    %254 = arith.mulf %252, %236 : vector<8x32xf32>
    %255 = arith.mulf %251, %250 : vector<8x32xf32>
    %256 = arith.addf %254, %255 : vector<8x32xf32>
    %257 = math.tanh %256 : vector<8x32xf32>
    %258 = arith.mulf %253, %257 : vector<8x32xf32>
    %c16_86 = arith.constant 16 : index
    %c0_87 = arith.constant 0 : index
    %259 = vector.load %arg10[%c16_86, %c0_87] : memref<72x32xf32, #tpu.memory_space<vmem>>, vector<8x32xf32>
    tpu.vector_store %arg10[%c16_86, %c0_87], %258 {strides = array<i32>} : memref<72x32xf32, #tpu.memory_space<vmem>>, vector<8x32xf32>,
    %c24_88 = arith.constant 24 : index
    %c0_89 = arith.constant 0 : index
    %260 = vector.load %arg11[%c24_88, %c0_89] : memref<72x128xf32, #tpu.memory_space<vmem>>, vector<8x128xf32>
    %cst_90 = arith.constant dense<0.000000e+00> : vector<8x128xf32>
    %261 = tpu.matmul %258, %197, %cst_90 {dimension_numbers = #tpu.dot_dimension_numbers<[1], [0], [0], [1], [0, 0, 1, 1], [], []>} : vector<8x32xf32>, vector<32x128xf32>, vector<8x128xf32> -> vector<8x128xf32>
    %262 = arith.addf %260, %261 : vector<8x128xf32>
    %263 = vector.extract_strided_slice %262 {offsets = [0, 0], sizes = [8, 96], strides = [1, 1]} : vector<8x128xf32> to vector<8x96xf32>
    %264 = arith.negf %263 : vector<8x96xf32>
    %265 = math.exp %264 : vector<8x96xf32>
    %cst_91 = arith.constant 1.000000e+00 : f32
    %266 = vector.broadcast %cst_91 : f32 to vector<8x96xf32>
    %267 = arith.addf %266, %265 : vector<8x96xf32>
    %268 = arith.divf %266, %267 : vector<8x96xf32>
    %269 = vector.extract_strided_slice %262 {offsets = [0, 96], sizes = [8, 32], strides = [1, 1]} : vector<8x128xf32> to vector<8x32xf32>
    %270 = math.tanh %269 : vector<8x32xf32>
    %271 = vector.extract_strided_slice %268 {offsets = [0, 0], sizes = [8, 32], strides = [1, 1]} : vector<8x96xf32> to vector<8x32xf32>
    %272 = vector.extract_strided_slice %268 {offsets = [0, 32], sizes = [8, 32], strides = [1, 1]} : vector<8x96xf32> to vector<8x32xf32>
    %273 = vector.extract_strided_slice %268 {offsets = [0, 64], sizes = [8, 32], strides = [1, 1]} : vector<8x96xf32> to vector<8x32xf32>
    %274 = arith.mulf %272, %256 : vector<8x32xf32>
    %275 = arith.mulf %271, %270 : vector<8x32xf32>
    %276 = arith.addf %274, %275 : vector<8x32xf32>
    %277 = math.tanh %276 : vector<8x32xf32>
    %278 = arith.mulf %273, %277 : vector<8x32xf32>
    %c24_92 = arith.constant 24 : index
    %c0_93 = arith.constant 0 : index
    %279 = vector.load %arg10[%c24_92, %c0_93] : memref<72x32xf32, #tpu.memory_space<vmem>>, vector<8x32xf32>
    tpu.vector_store %arg10[%c24_92, %c0_93], %278 {strides = array<i32>} : memref<72x32xf32, #tpu.memory_space<vmem>>, vector<8x32xf32>,
    %c32_94 = arith.constant 32 : index
    %c0_95 = arith.constant 0 : index
    %280 = vector.load %arg11[%c32_94, %c0_95] : memref<72x128xf32, #tpu.memory_space<vmem>>, vector<8x128xf32>
    %cst_96 = arith.constant dense<0.000000e+00> : vector<8x128xf32>
    %281 = tpu.matmul %278, %197, %cst_96 {dimension_numbers = #tpu.dot_dimension_numbers<[1], [0], [0], [1], [0, 0, 1, 1], [], []>} : vector<8x32xf32>, vector<32x128xf32>, vector<8x128xf32> -> vector<8x128xf32>
    %282 = arith.addf %280, %281 : vector<8x128xf32>
    %283 = vector.extract_strided_slice %282 {offsets = [0, 0], sizes = [8, 96], strides = [1, 1]} : vector<8x128xf32> to vector<8x96xf32>
    %284 = arith.negf %283 : vector<8x96xf32>
    %285 = math.exp %284 : vector<8x96xf32>
    %cst_97 = arith.constant 1.000000e+00 : f32
    %286 = vector.broadcast %cst_97 : f32 to vector<8x96xf32>
    %287 = arith.addf %286, %285 : vector<8x96xf32>
    %288 = arith.divf %286, %287 : vector<8x96xf32>
    %289 = vector.extract_strided_slice %282 {offsets = [0, 96], sizes = [8, 32], strides = [1, 1]} : vector<8x128xf32> to vector<8x32xf32>
    %290 = math.tanh %289 : vector<8x32xf32>
    %291 = vector.extract_strided_slice %288 {offsets = [0, 0], sizes = [8, 32], strides = [1, 1]} : vector<8x96xf32> to vector<8x32xf32>
    %292 = vector.extract_strided_slice %288 {offsets = [0, 32], sizes = [8, 32], strides = [1, 1]} : vector<8x96xf32> to vector<8x32xf32>
    %293 = vector.extract_strided_slice %288 {offsets = [0, 64], sizes = [8, 32], strides = [1, 1]} : vector<8x96xf32> to vector<8x32xf32>
    %294 = arith.mulf %292, %276 : vector<8x32xf32>
    %295 = arith.mulf %291, %290 : vector<8x32xf32>
    %296 = arith.addf %294, %295 : vector<8x32xf32>
    %297 = math.tanh %296 : vector<8x32xf32>
    %298 = arith.mulf %293, %297 : vector<8x32xf32>
    %c32_98 = arith.constant 32 : index
    %c0_99 = arith.constant 0 : index
    %299 = vector.load %arg10[%c32_98, %c0_99] : memref<72x32xf32, #tpu.memory_space<vmem>>, vector<8x32xf32>
    tpu.vector_store %arg10[%c32_98, %c0_99], %298 {strides = array<i32>} : memref<72x32xf32, #tpu.memory_space<vmem>>, vector<8x32xf32>,
    %c40_100 = arith.constant 40 : index
    %c0_101 = arith.constant 0 : index
    %300 = vector.load %arg11[%c40_100, %c0_101] : memref<72x128xf32, #tpu.memory_space<vmem>>, vector<8x128xf32>
    %cst_102 = arith.constant dense<0.000000e+00> : vector<8x128xf32>
    %301 = tpu.matmul %298, %197, %cst_102 {dimension_numbers = #tpu.dot_dimension_numbers<[1], [0], [0], [1], [0, 0, 1, 1], [], []>} : vector<8x32xf32>, vector<32x128xf32>, vector<8x128xf32> -> vector<8x128xf32>
    %302 = arith.addf %300, %301 : vector<8x128xf32>
    %303 = vector.extract_strided_slice %302 {offsets = [0, 0], sizes = [8, 96], strides = [1, 1]} : vector<8x128xf32> to vector<8x96xf32>
    %304 = arith.negf %303 : vector<8x96xf32>
    %305 = math.exp %304 : vector<8x96xf32>
    %cst_103 = arith.constant 1.000000e+00 : f32
    %306 = vector.broadcast %cst_103 : f32 to vector<8x96xf32>
    %307 = arith.addf %306, %305 : vector<8x96xf32>
    %308 = arith.divf %306, %307 : vector<8x96xf32>
    %309 = vector.extract_strided_slice %302 {offsets = [0, 96], sizes = [8, 32], strides = [1, 1]} : vector<8x128xf32> to vector<8x32xf32>
    %310 = math.tanh %309 : vector<8x32xf32>
    %311 = vector.extract_strided_slice %308 {offsets = [0, 0], sizes = [8, 32], strides = [1, 1]} : vector<8x96xf32> to vector<8x32xf32>
    %312 = vector.extract_strided_slice %308 {offsets = [0, 32], sizes = [8, 32], strides = [1, 1]} : vector<8x96xf32> to vector<8x32xf32>
    %313 = vector.extract_strided_slice %308 {offsets = [0, 64], sizes = [8, 32], strides = [1, 1]} : vector<8x96xf32> to vector<8x32xf32>
    %314 = arith.mulf %312, %296 : vector<8x32xf32>
    %315 = arith.mulf %311, %310 : vector<8x32xf32>
    %316 = arith.addf %314, %315 : vector<8x32xf32>
    %317 = math.tanh %316 : vector<8x32xf32>
    %318 = arith.mulf %313, %317 : vector<8x32xf32>
    %c40_104 = arith.constant 40 : index
    %c0_105 = arith.constant 0 : index
    %319 = vector.load %arg10[%c40_104, %c0_105] : memref<72x32xf32, #tpu.memory_space<vmem>>, vector<8x32xf32>
    tpu.vector_store %arg10[%c40_104, %c0_105], %318 {strides = array<i32>} : memref<72x32xf32, #tpu.memory_space<vmem>>, vector<8x32xf32>,
    %c48_106 = arith.constant 48 : index
    %c0_107 = arith.constant 0 : index
    %320 = vector.load %arg11[%c48_106, %c0_107] : memref<72x128xf32, #tpu.memory_space<vmem>>, vector<8x128xf32>
    %cst_108 = arith.constant dense<0.000000e+00> : vector<8x128xf32>
    %321 = tpu.matmul %318, %197, %cst_108 {dimension_numbers = #tpu.dot_dimension_numbers<[1], [0], [0], [1], [0, 0, 1, 1], [], []>} : vector<8x32xf32>, vector<32x128xf32>, vector<8x128xf32> -> vector<8x128xf32>
    %322 = arith.addf %320, %321 : vector<8x128xf32>
    %323 = vector.extract_strided_slice %322 {offsets = [0, 0], sizes = [8, 96], strides = [1, 1]} : vector<8x128xf32> to vector<8x96xf32>
    %324 = arith.negf %323 : vector<8x96xf32>
    %325 = math.exp %324 : vector<8x96xf32>
    %cst_109 = arith.constant 1.000000e+00 : f32
    %326 = vector.broadcast %cst_109 : f32 to vector<8x96xf32>
    %327 = arith.addf %326, %325 : vector<8x96xf32>
    %328 = arith.divf %326, %327 : vector<8x96xf32>
    %329 = vector.extract_strided_slice %322 {offsets = [0, 96], sizes = [8, 32], strides = [1, 1]} : vector<8x128xf32> to vector<8x32xf32>
    %330 = math.tanh %329 : vector<8x32xf32>
    %331 = vector.extract_strided_slice %328 {offsets = [0, 0], sizes = [8, 32], strides = [1, 1]} : vector<8x96xf32> to vector<8x32xf32>
    %332 = vector.extract_strided_slice %328 {offsets = [0, 32], sizes = [8, 32], strides = [1, 1]} : vector<8x96xf32> to vector<8x32xf32>
    %333 = vector.extract_strided_slice %328 {offsets = [0, 64], sizes = [8, 32], strides = [1, 1]} : vector<8x96xf32> to vector<8x32xf32>
    %334 = arith.mulf %332, %316 : vector<8x32xf32>
    %335 = arith.mulf %331, %330 : vector<8x32xf32>
    %336 = arith.addf %334, %335 : vector<8x32xf32>
    %337 = math.tanh %336 : vector<8x32xf32>
    %338 = arith.mulf %333, %337 : vector<8x32xf32>
    %c48_110 = arith.constant 48 : index
    %c0_111 = arith.constant 0 : index
    %339 = vector.load %arg10[%c48_110, %c0_111] : memref<72x32xf32, #tpu.memory_space<vmem>>, vector<8x32xf32>
    tpu.vector_store %arg10[%c48_110, %c0_111], %338 {strides = array<i32>} : memref<72x32xf32, #tpu.memory_space<vmem>>, vector<8x32xf32>,
    %c56_112 = arith.constant 56 : index
    %c0_113 = arith.constant 0 : index
    %340 = vector.load %arg11[%c56_112, %c0_113] : memref<72x128xf32, #tpu.memory_space<vmem>>, vector<8x128xf32>
    %cst_114 = arith.constant dense<0.000000e+00> : vector<8x128xf32>
    %341 = tpu.matmul %338, %197, %cst_114 {dimension_numbers = #tpu.dot_dimension_numbers<[1], [0], [0], [1], [0, 0, 1, 1], [], []>} : vector<8x32xf32>, vector<32x128xf32>, vector<8x128xf32> -> vector<8x128xf32>
    %342 = arith.addf %340, %341 : vector<8x128xf32>
    %343 = vector.extract_strided_slice %342 {offsets = [0, 0], sizes = [8, 96], strides = [1, 1]} : vector<8x128xf32> to vector<8x96xf32>
    %344 = arith.negf %343 : vector<8x96xf32>
    %345 = math.exp %344 : vector<8x96xf32>
    %cst_115 = arith.constant 1.000000e+00 : f32
    %346 = vector.broadcast %cst_115 : f32 to vector<8x96xf32>
    %347 = arith.addf %346, %345 : vector<8x96xf32>
    %348 = arith.divf %346, %347 : vector<8x96xf32>
    %349 = vector.extract_strided_slice %342 {offsets = [0, 96], sizes = [8, 32], strides = [1, 1]} : vector<8x128xf32> to vector<8x32xf32>
    %350 = math.tanh %349 : vector<8x32xf32>
    %351 = vector.extract_strided_slice %348 {offsets = [0, 0], sizes = [8, 32], strides = [1, 1]} : vector<8x96xf32> to vector<8x32xf32>
    %352 = vector.extract_strided_slice %348 {offsets = [0, 32], sizes = [8, 32], strides = [1, 1]} : vector<8x96xf32> to vector<8x32xf32>
    %353 = vector.extract_strided_slice %348 {offsets = [0, 64], sizes = [8, 32], strides = [1, 1]} : vector<8x96xf32> to vector<8x32xf32>
    %354 = arith.mulf %352, %336 : vector<8x32xf32>
    %355 = arith.mulf %351, %350 : vector<8x32xf32>
    %356 = arith.addf %354, %355 : vector<8x32xf32>
    %357 = math.tanh %356 : vector<8x32xf32>
    %358 = arith.mulf %353, %357 : vector<8x32xf32>
    %c56_116 = arith.constant 56 : index
    %c0_117 = arith.constant 0 : index
    %359 = vector.load %arg10[%c56_116, %c0_117] : memref<72x32xf32, #tpu.memory_space<vmem>>, vector<8x32xf32>
    tpu.vector_store %arg10[%c56_116, %c0_117], %358 {strides = array<i32>} : memref<72x32xf32, #tpu.memory_space<vmem>>, vector<8x32xf32>,
    %c64_118 = arith.constant 64 : index
    %c0_119 = arith.constant 0 : index
    %360 = vector.load %arg11[%c64_118, %c0_119] : memref<72x128xf32, #tpu.memory_space<vmem>>, vector<8x128xf32>
    %cst_120 = arith.constant dense<0.000000e+00> : vector<8x128xf32>
    %361 = tpu.matmul %358, %197, %cst_120 {dimension_numbers = #tpu.dot_dimension_numbers<[1], [0], [0], [1], [0, 0, 1, 1], [], []>} : vector<8x32xf32>, vector<32x128xf32>, vector<8x128xf32> -> vector<8x128xf32>
    %362 = arith.addf %360, %361 : vector<8x128xf32>
    %363 = vector.extract_strided_slice %362 {offsets = [0, 0], sizes = [8, 96], strides = [1, 1]} : vector<8x128xf32> to vector<8x96xf32>
    %364 = arith.negf %363 : vector<8x96xf32>
    %365 = math.exp %364 : vector<8x96xf32>
    %cst_121 = arith.constant 1.000000e+00 : f32
    %366 = vector.broadcast %cst_121 : f32 to vector<8x96xf32>
    %367 = arith.addf %366, %365 : vector<8x96xf32>
    %368 = arith.divf %366, %367 : vector<8x96xf32>
    %369 = vector.extract_strided_slice %362 {offsets = [0, 96], sizes = [8, 32], strides = [1, 1]} : vector<8x128xf32> to vector<8x32xf32>
    %370 = math.tanh %369 : vector<8x32xf32>
    %371 = vector.extract_strided_slice %368 {offsets = [0, 0], sizes = [8, 32], strides = [1, 1]} : vector<8x96xf32> to vector<8x32xf32>
    %372 = vector.extract_strided_slice %368 {offsets = [0, 32], sizes = [8, 32], strides = [1, 1]} : vector<8x96xf32> to vector<8x32xf32>
    %373 = vector.extract_strided_slice %368 {offsets = [0, 64], sizes = [8, 32], strides = [1, 1]} : vector<8x96xf32> to vector<8x32xf32>
    %374 = arith.mulf %372, %356 : vector<8x32xf32>
    %375 = arith.mulf %371, %370 : vector<8x32xf32>
    %376 = arith.addf %374, %375 : vector<8x32xf32>
    %377 = math.tanh %376 : vector<8x32xf32>
    %378 = arith.mulf %373, %377 : vector<8x32xf32>
    %c64_122 = arith.constant 64 : index
    %c0_123 = arith.constant 0 : index
    %379 = vector.load %arg10[%c64_122, %c0_123] : memref<72x32xf32, #tpu.memory_space<vmem>>, vector<8x32xf32>
    tpu.vector_store %arg10[%c64_122, %c0_123], %378 {strides = array<i32>} : memref<72x32xf32, #tpu.memory_space<vmem>>, vector<8x32xf32>,
    %c0_124 = arith.constant 0 : index
    %c0_125 = arith.constant 0 : index
    %380 = vector.load %arg10[%c0_124, %c0_125] : memref<72x32xf32, #tpu.memory_space<vmem>>, vector<72x32xf32>
    %c0_126 = arith.constant 0 : index
    %c0_127 = arith.constant 0 : index
    %381 = vector.load %arg7[%c0_126, %c0_127] : memref<32x128xf32, #tpu.memory_space<vmem>>, vector<32x128xf32>
    %cst_128 = arith.constant dense<0.000000e+00> : vector<72x128xf32>
    %382 = tpu.matmul %380, %381, %cst_128 {dimension_numbers = #tpu.dot_dimension_numbers<[1], [0], [0], [1], [0, 0, 1, 1], [], []>} : vector<72x32xf32>, vector<32x128xf32>, vector<72x128xf32> -> vector<72x128xf32>
    %c0_129 = arith.constant 0 : index
    %c0_130 = arith.constant 0 : index
    %383 = vector.load %arg8[%c0_129, %c0_130] : memref<1x128xf32, #tpu.memory_space<vmem>>, vector<1x128xf32>
    %384 = vector.broadcast %383 : vector<1x128xf32> to vector<72x128xf32>
    %385 = arith.addf %382, %384 : vector<72x128xf32>
    %c0_131 = arith.constant 0 : index
    %c0_132 = arith.constant 0 : index
    %386 = vector.load %arg9[%c0_131, %c0_132] : memref<72x128xf32, #tpu.memory_space<vmem>>, vector<72x128xf32>
    tpu.vector_store %arg9[%c0_131, %c0_132], %385 {strides = array<i32>} : memref<72x128xf32, #tpu.memory_space<vmem>>, vector<72x128xf32>,
    return
  }
}

</mosaic_0001>

<bundles_post_ra>
// kernel: tpu_custom_call.1
= control target key start
LH: loop header
LB: loop body
LE: loop exit
PB: predicated region body
PF: predicated region fallthrough
CT: control target
= control target key end

     0   :  { %14 = vsyncpa [#allocation5], 0  ;;  %s3819_s0 = inlined_call_operand.vmem [shape: f32[72,32], index: 0, kind: input, shape index: {}]   ;;  %s3820_s1 = inlined_call_operand.vmem [shape: f32[32,128], index: 1, kind: input, shape index: {}]   ;;  %s3821_s2 = inlined_call_operand.vmem [shape: f32[32,128], index: 2, kind: input, shape index: {}]   ;;  %s3822_s3 = inlined_call_operand.vmem [shape: f32[32,128], index: 3, kind: input, shape index: {}]   ;;  %s3823_s4 = inlined_call_operand.hbm [shape: f32[32,128], index: 4, kind: input, shape index: {}]   ;;  %s3824_s5 = inlined_call_operand.vmem [shape: f32[1,128], index: 5, kind: input, shape index: {}]   ;;  %s3825_s6 = inlined_call_operand.vmem [shape: f32[1,128], index: 6, kind: input, shape index: {}]   ;;  %s3826_s7 = inlined_call_operand.vmem [shape: f32[32,128], index: 7, kind: input, shape index: {}]   ;;  %s3827_s8 = inlined_call_operand.vmem [shape: f32[1,128], index: 8, kind: input, shape index: {}]   ;;  %s3828_s9 = inlined_call_operand.hbm [shape: f32[72,128], index: 9, kind: output, shape index: {}]  }
   0x1   :  { %15 = vsyncpa [#allocation6], 0  ;;  %s3300_s30 = smov [#allocation4]   ;;  %s3252_s13 = scalar_lea.hbm %s3823_s4, 512 }
   0x2   :  { %s29_s10 = sshll.u32 %s3300_s30, 4  ;;  %p3253_p0 = scmp.ne.s32.totalorder %s3823_s4, %s3252_s13  ;;  %s30_s10 = int_to_ptr.vmem [resolvable:$true] %s29_s10 }
   0x3   :  { %p3256_p1 = scmp.lt.u32.totalorder %s3252_s13, %s3823_s4 }
   0x5   :  { %p3258_p2 = pnand %p3256_p1, %p3253_p0 }
   0x7   :  { %3261 = shalt.err (!%p3258_p2)
}
   0x8   :  { %s3262_s18 = scalar_lea.vmem %s30_s10, 512  ;;  %p3267_p4 = scmp.lt.s32.totalorder %s30_s10, %s30_s10 }
   0x9   :  { %p3263_p3 = scmp.ne.s32.totalorder %s30_s10, %s3262_s18  ;;  %p3268_p5 = scmp.lt.s32.totalorder %s3262_s18, %s3262_s18 }
   0xb   :  { %p3269_p6 = por %p3268_p5, %p3267_p4 }
   0xd   :  { %p3270_p7 = pnand %p3269_p6, %p3263_p3 }
   0xf   :  { %3273 = shalt.err (!%p3270_p7)
}
  0x10   :  { %s3301_s19 = smov 128   ;;  %s3302_s20 = smov 8  }
  0x11   :  { %35 = dma.hbm_to_vmem [thread:$0]  %s3823_s4, 512, %s30_s10, [#allocation5], %s3301_s19, %s3301_s19, %s3302_s20  }
  0x12   :  { %3296 = dma.done.wait [#allocation5], 512  }
  0x13   :  { %3297 = vsyncadd [#allocation5], 4294966784  ;;  %v3303_v0 = vmov 0.0|0.0   ;;  %vm3304_vm0 = vmmov 0   ;;  %v3305_v1 = vmov 0.0   ;;  %v56_v2 = vld [vmem:[%s3820_s1] sm:$0xff] }
  0x14   :  { %2920 = vmatprep.subr.bf16.mxu0 %v3303_v0  ;;  %2625 = vmatprep.mubr.msk.f32.mxu0 %vm3304_vm0, %v3305_v1  ;;  %v57_v3 = vld [vmem:[%s3820_s1 + $0x8] sm:$0xff]  ;;  %v58_v4 = vld [vmem:[%s3820_s1 + $0x10] sm:$0xff]  ;;  %v59_v6 = vld [vmem:[%s3820_s1 + $0x18] sm:$0xff]  ;;  %vm67_vm1 = vcmask 261120   ;;  %s3306_s26 = smov 32  }
  0x15   :  { %3046 = vmatprep.subr.bf16.mxu1 %v3303_v0  ;;  %2637 = vmatprep.mubr.msk.f32.mxu1 %vm3304_vm0, %v3305_v1  ;;  %v2921_v5 = vpack.c.bf16 %v57_v3, %v56_v2  ;;  %v2924_v7 = vpack.c.bf16 %v59_v6, %v58_v4  ;;  %v214_v8 = vld [vmem:[%s3822_s3] sm:$0xff]  ;;  %v215_v9 = vld [vmem:[%s3822_s3 + $0x8] sm:$0xff]  ;;  %v216_v12 = vld [vmem:[%s3822_s3 + $0x10] sm:$0xff] }
  0x16   :  { %v47_v10 = vld [vmem:[%s3819_s0] sm:$0xff]  ;;  %v3403_v11 = vpack.c.bf16 %v215_v9, %v214_v8  ;;  %v217_v13 = vld [vmem:[%s3822_s3 + $0x18] sm:$0xff]  ;;  %v48_v14 = vld [vmem:[%s3819_s0 + $0x8] sm:$0xff] }
  0x17   :  { %2922 = vmatpush3.bf16.msra.mxu0 %v2921_v5  ;;  %3048 = vmatpush3.bf16.msra.mxu1 %v2921_v5  ;;  %v3420_v15 = vpack.c.bf16 %v217_v13, %v216_v12  ;;  %v49_v16 = vld [vmem:[%s3819_s0 + $0x10] sm:$0xff]  ;;  %v50_v17 = vld [vmem:[%s3819_s0 + $0x18] sm:$0xff]  ;;  %v3450_v18 = vld [vmem:[%s3824_s5] ss:$0 sm:$0xff] }
  0x18   :  { %2923 = vmatprep.subr.bf16.mxu0 %v3303_v0  ;;  %3047 = vmatprep.subr.bf16.mxu1 %v3303_v0  ;;  %v51_v32 = vld [vmem:[%s3819_s0 + $0x20] sm:$0xff]  ;;  %v52_v33 = vld [vmem:[%s3819_s0 + $0x28] sm:$0xff]  ;;  %v53_v34 = vld [vmem:[%s3819_s0 + $0x30] sm:$0xff] }
  0x19   :  { %v1155_v36 = vld [vmem:[%s3821_s2] sm:$0xff]  ;;  %v1156_v37 = vld [vmem:[%s3821_s2 + $0x8] sm:$0xff]  ;;  %v54_v38 = vld [vmem:[%s3819_s0 + $0x38] sm:$0xff] }
  0x1a   :  { %v2981_v39 = vpack.c.bf16 %v1156_v37, %v1155_v36  ;;  %v1157_v40 = vld [vmem:[%s3821_s2 + $0x10] sm:$0xff]  ;;  %v1158_v41 = vld [vmem:[%s3821_s2 + $0x18] sm:$0xff]  ;;  %v55_v42 = vld [vmem:[%s3819_s0 + $0x40] sm:$0xff]  ;;  %s3307_s2 = smov 64  }
  0x1b   :  { %2925 = vmatpush3.bf16.msra.mxu0 %v2924_v7  ;;  %3049 = vmatpush3.bf16.msra.mxu1 %v2924_v7  ;;  %v2984_v43 = vpack.c.bf16 %v1158_v41, %v1157_v40 }
  0x1c   :  { %2926 = vmatprep.subr.bf16.mxu0 %v3303_v0  ;;  %2980 = vmatprep.subr.bf16.mxu1 %v3303_v0 }
  0x1e   :  { %2626 = vmatmul.mubr.msk.f32.vlgmr.msra.gmra.mrb[0].mxu0 %vm67_vm1, %v47_v10  ;;  %2638 = vmatmul.mubr.msk.f32.vlgmr.msra.gmra.mrb[0].mxu1 %vm67_vm1, %v51_v32 }
  0x1f   :  { %2928 = vmatpush3.bf16.msra.mxu0 %v3403_v11  ;;  %2628 = vmatprep.mubr.msk.f32.mxu0 %vm3304_vm0, %v3305_v1 }
  0x20   :  { %2929 = vmatprep.subr.bf16.mxu0 %v3303_v0  ;;  %2640 = vmatprep.mubr.msk.f32.mxu1 %vm3304_vm0, %v3305_v1 }
  0x21   :  { %2982 = vmatpush3.bf16.msra.mxu1 %v2981_v39 }
  0x22   :  { %2629 = vmatmul.mubr.msk.f32.gmra.mrb[2].mxu0 %vm67_vm1, %v48_v14  ;;  %2641 = vmatmul.mubr.msk.f32.gmra.mrb[2].mxu1 %vm67_vm1, %v52_v33 }
  0x23   :  { %2631 = vmatprep.mubr.msk.f32.mxu0 %vm3304_vm0, %v3305_v1  ;;  %2931 = vmatpush3.bf16.msra.mxu0 %v3420_v15 }
  0x24   :  { %2932 = vmatprep.subr.bf16.mxu0 %v3303_v0  ;;  %2643 = vmatprep.mubr.msk.f32.mxu1 %vm3304_vm0, %v3305_v1 }
  0x25   :  { %2983 = vmatprep.subr.bf16.mxu1 %v3303_v0 }
  0x26   :  { %2632 = vmatmul.mubr.msk.f32.gmra.mrb[4].mxu0 %vm67_vm1, %v49_v16  ;;  %2644 = vmatmul.mubr.msk.f32.gmra.mrb[4].mxu1 %vm67_vm1, %v53_v34 }
  0x27   :  { %2634 = vmatprep.mubr.msk.f32.mxu0 %vm3304_vm0, %v3305_v1  ;;  %2646 = vmatprep.mubr.msk.f32.mxu1 %vm3304_vm0, %v3305_v1 }
  0x28   :  { %2985 = vmatpush3.bf16.msra.mxu1 %v2984_v43 }
  0x29   :  { %2986 = vmatprep.subr.bf16.mxu1 %v3303_v0 }
  0x2a   :  { %2635 = vmatmul.mubr.msk.f32.gmra.mrb[6].mxu0 %vm67_vm1, %v50_v17  ;;  %2647 = vmatmul.mubr.msk.f32.gmra.mrb[6].mxu1 %vm67_vm1, %v54_v38 }
  0x2b   :  { %2660 = vmatprep.mubr.msk.f32.mxu0 %vm3304_vm0, %v3305_v1  ;;  %2649 = vmatprep.mubr.msk.f32.mxu1 %vm3304_vm0, %v3305_v1 }
  0x2e   :  { %2661 = vmatmul.mubr.f32.vlgmr.msra.gmra.mrb[0].mxu0 %v3305_v1  ;;  %2650 = vmatmul.mubr.msk.f32.gmra.mrb[8].mxu1 %vm67_vm1, %v55_v42 }
  0x2f   :  { %2934 = vmatpush3.bf16.msra.mxu0 %v3403_v11  ;;  %2671 = vmatprep.mubr.msk.f32.mxu0 %vm3304_vm0, %v3305_v1 }
  0x30   :  { %2935 = vmatprep.subr.bf16.mxu0 %v3303_v0  ;;  %2759 = vmatprep.mubr.msk.f32.mxu1 %vm3304_vm0, %v3305_v1 }
  0x33   :  { %2937 = vmatpush3.bf16.msra.mxu0 %v3420_v15 }
  0x34   :  { %2938 = vmatprep.subr.bf16.mxu0 %v3303_v0 }
  0xf1   :  { %v181_v39 = vpop.f32.mrb[0].mxu1 }
  0xf2   :  { %v2639_v40 = vpop.f32.mrb[1].mxu1 }
 0x101   :  { %v288_v19 = vpop.f32.mrb[0].mxu0 }
 0x102   :  { %v3050_v20 = vadd.f32 %v3450_v18, %v288_v19  ;;  %v2662_v21 = vpop.f32.mrb[1].mxu0 }
 0x104   :  { %3108 = vtanh.f32 %v3050_v20  ;;  %v2434_v23 = vmul.f32 -1.442695, %v3050_v20 }
 0x106   :  { %3110 = vpow2.f32 %v2434_v23 }
 0x10e   :  { %v3109_v22 = vpop.eup %3108 }
 0x10f   :  { %302 = vrot.lane.b32.xlu0 %v3109_v22, %s3306_s26 }
 0x110   :  { %v3111_v24 = vpop.eup %3110 }
 0x111   :  { %v296_v25 = vadd.f32 1.0, %v3111_v24 }
 0x113   :  { %3112 = vrcp.f32 %v296_v25 }
 0x11d   :  { %v3113_v26 = vpop.eup %3112 }
 0x11e   :  { %v300_v29 = vmul.f32 0.0, %v3113_v26 }
 0x181   :  { %v303_v27 = vpop.permute.xlu0 %302 }
 0x182   :  { %v305_v28 = vmul.f32 %v3113_v26, %v303_v27 }
 0x184   :  { %307 = vrot.lane.b32.xlu0 %v305_v28, %s3306_s26 }
 0x1f6   :  { %v308_v30 = vpop.permute.xlu0 %307 }
 0x1f7   :  { %v310_v31 = vadd.f32 %v308_v30, %v300_v29 }
 0x1f9   :  { %3114 = vtanh.f32 %v310_v31 }
 0x203   :  { %v3115_v35 = vpop.eup %3114 }
 0x204   :  { %313 = vrot.lane.b32.xlu1 %v3115_v35, %s3306_s26 }
 0x276   :  { %v314_v44 = vpop.permute.xlu1 %313 }
 0x277   :  { %v316_v45 = vmul.f32 %v3113_v26, %v314_v44 }
 0x279   :  { %318 = vrot.lane.b32.xlu1 %v316_v45, %s3307_s2  ;;  %v182_v45 = vadd.f32 %v3450_v18, %v181_v39 }
 0x2eb   :  { %v319_v46 = vpop.permute.xlu1 %318 }
 0x2ec   :  { %321 = vst.msk [vmem:[#allocation2] sm:$0xff] %vm67_vm1, %v319_v46  ;;  %2672 = vmatmul.mubr.msk.f32.vlgmr.msra.gmra.mrb[2].mxu0 %vm67_vm1, %v319_v46 }
 0x2ed   :  { %2940 = vmatpush3.bf16.msra.mxu0 %v3403_v11  ;;  %2682 = vmatprep.mubr.msk.f32.mxu0 %vm3304_vm0, %v3305_v1 }
 0x2ee   :  { %2941 = vmatprep.subr.bf16.mxu0 %v3303_v0 }
 0x2f1   :  { %2943 = vmatpush3.bf16.msra.mxu0 %v3420_v15 }
 0x2f2   :  { %2944 = vmatprep.subr.bf16.mxu0 %v3303_v0 }
 0x2f3   :  { %v1146_v47 = vld [vmem:[#allocation2] sm:$0xff] }
 0x2f4   :  { %2760 = vmatmul.mubr.msk.f32.vlgmr.msra.gmra.mrb[10].mxu1 %vm67_vm1, %v1146_v47 }
 0x2f5   :  { %2762 = vmatprep.mubr.msk.f32.mxu1 %vm3304_vm0, %v3305_v1 }
 0x3bf   :  { %v391_v48 = vpop.f32.mrb[2].mxu0 }
 0x3c0   :  { %v3051_v49 = vadd.f32 %v3450_v18, %v391_v48  ;;  %v2673_v50 = vpop.f32.mrb[3].mxu0 }
 0x3c2   :  { %3116 = vtanh.f32 %v3051_v49  ;;  %v2436_v52 = vmul.f32 -1.442695, %v3051_v49 }
 0x3c4   :  { %3118 = vpow2.f32 %v2436_v52 }
 0x3cc   :  { %v3117_v51 = vpop.eup %3116 }
 0x3cd   :  { %405 = vrot.lane.b32.xlu0 %v3117_v51, %s3306_s26 }
 0x3ce   :  { %v3119_v53 = vpop.eup %3118 }
 0x3cf   :  { %v399_v54 = vadd.f32 1.0, %v3119_v53 }
 0x3d1   :  { %3120 = vrcp.f32 %v399_v54 }
 0x3db   :  { %v3121_v55 = vpop.eup %3120 }
 0x3dc   :  { %v403_v58 = vmul.f32 %v3121_v55, %v310_v31 }
 0x43f   :  { %v406_v56 = vpop.permute.xlu0 %405 }
 0x440   :  { %v408_v57 = vmul.f32 %v3121_v55, %v406_v56 }
 0x442   :  { %410 = vrot.lane.b32.xlu1 %v408_v57, %s3306_s26 }
 0x4b4   :  { %v411_v59 = vpop.permute.xlu1 %410 }
 0x4b5   :  { %v413_v60 = vadd.f32 %v411_v59, %v403_v58 }
 0x4b7   :  { %3122 = vtanh.f32 %v413_v60 }
 0x4c1   :  { %v3123_v61 = vpop.eup %3122 }
 0x4c2   :  { %416 = vrot.lane.b32.xlu0 %v3123_v61, %s3306_s26 }
 0x534   :  { %v417_v62 = vpop.permute.xlu0 %416 }
 0x535   :  { %v419_v63 = vmul.f32 %v3121_v55, %v417_v62 }
 0x537   :  { %421 = vrot.lane.b32.xlu1 %v419_v63, %s3307_s2 }
 0x5a9   :  { %v422_v2 = vpop.permute.xlu1 %421 }
 0x5aa   :  { %424 = vst.msk [vmem:[#allocation2 + $0x8] sm:$0xff] %vm67_vm1, %v422_v2  ;;  %2683 = vmatmul.mubr.msk.f32.vlgmr.msra.gmra.mrb[4].mxu0 %vm67_vm1, %v422_v2 }
 0x5ab   :  { %2946 = vmatpush3.bf16.msra.mxu0 %v3403_v11  ;;  %2693 = vmatprep.mubr.msk.f32.mxu0 %vm3304_vm0, %v3305_v1 }
 0x5ac   :  { %2947 = vmatprep.subr.bf16.mxu0 %v3303_v0 }
 0x5af   :  { %2949 = vmatpush3.bf16.msra.mxu0 %v3420_v15 }
 0x5b0   :  { %2950 = vmatprep.subr.bf16.mxu0 %v3303_v0 }
 0x5b1   :  { %v1147_v3 = vld [vmem:[#allocation2 + $0x8] sm:$0xff] }
 0x5b2   :  { %2763 = vmatmul.mubr.msk.f32.gmra.mrb[12].mxu1 %vm67_vm1, %v1147_v3 }
 0x5b3   :  { %2765 = vmatprep.mubr.msk.f32.mxu1 %vm3304_vm0, %v3305_v1 }
 0x67d   :  { %v494_v4 = vpop.f32.mrb[4].mxu0 }
 0x67e   :  { %v3052_v5 = vadd.f32 %v3450_v18, %v494_v4  ;;  %v2684_v6 = vpop.f32.mrb[5].mxu0 }
 0x680   :  { %3124 = vtanh.f32 %v3052_v5  ;;  %v2438_v8 = vmul.f32 -1.442695, %v3052_v5 }
 0x682   :  { %3126 = vpow2.f32 %v2438_v8 }
 0x68a   :  { %v3125_v7 = vpop.eup %3124 }
 0x68b   :  { %508 = vrot.lane.b32.xlu0 %v3125_v7, %s3306_s26 }
 0x68c   :  { %v3127_v9 = vpop.eup %3126 }
 0x68d   :  { %v502_v10 = vadd.f32 1.0, %v3127_v9 }
 0x68f   :  { %3128 = vrcp.f32 %v502_v10 }
 0x699   :  { %v3129_v12 = vpop.eup %3128 }
 0x69a   :  { %v506_v16 = vmul.f32 %v3129_v12, %v413_v60  ;;  %v186_v60 = vpop.f32.mrb[2].mxu1 }
 0x69b   :  { %v2642_v61 = vpop.f32.mrb[3].mxu1  ;;  %v187_v4 = vadd.f32 %v3450_v18, %v186_v60 }
 0x6fd   :  { %v509_v13 = vpop.permute.xlu0 %508 }
 0x6fe   :  { %v511_v14 = vmul.f32 %v3129_v12, %v509_v13 }
 0x700   :  { %513 = vrot.lane.b32.xlu1 %v511_v14, %s3306_s26 }
 0x772   :  { %v514_v17 = vpop.permute.xlu1 %513 }
 0x773   :  { %v516_v19 = vadd.f32 %v514_v17, %v506_v16 }
 0x775   :  { %3130 = vtanh.f32 %v516_v19 }
 0x77f   :  { %v3131_v20 = vpop.eup %3130 }
 0x780   :  { %519 = vrot.lane.b32.xlu0 %v3131_v20, %s3306_s26 }
 0x7f2   :  { %v520_v21 = vpop.permute.xlu0 %519 }
 0x7f3   :  { %v522_v22 = vmul.f32 %v3129_v12, %v520_v21 }
 0x7f5   :  { %524 = vrot.lane.b32.xlu1 %v522_v22, %s3307_s2  ;;  %v191_v22 = vpop.f32.mrb[4].mxu1 }
 0x867   :  { %v525_v23 = vpop.permute.xlu1 %524 }
 0x868   :  { %527 = vst.msk [vmem:[#allocation2 + $0x10] sm:$0xff] %vm67_vm1, %v525_v23  ;;  %2694 = vmatmul.mubr.msk.f32.vlgmr.msra.gmra.mrb[6].mxu0 %vm67_vm1, %v525_v23  ;;  %v2645_v23 = vpop.f32.mrb[5].mxu1 }
 0x869   :  { %2952 = vmatpush3.bf16.msra.mxu0 %v3403_v11  ;;  %2704 = vmatprep.mubr.msk.f32.mxu0 %vm3304_vm0, %v3305_v1  ;;  %v1313_v23 = vld [vmem:[#allocation4 + $0x8] sm:$0xff] }
 0x86a   :  { %2953 = vmatprep.subr.bf16.mxu0 %v3303_v0 }
 0x86d   :  { %2955 = vmatpush3.bf16.msra.mxu0 %v3420_v15 }
 0x86e   :  { %2956 = vmatprep.subr.bf16.mxu0 %v3303_v0 }
 0x86f   :  { %v1148_v24 = vld [vmem:[#allocation2 + $0x10] sm:$0xff] }
 0x870   :  { %2766 = vmatmul.mubr.msk.f32.gmra.mrb[14].mxu1 %vm67_vm1, %v1148_v24 }
 0x871   :  { %2768 = vmatprep.mubr.msk.f32.mxu1 %vm3304_vm0, %v3305_v1 }
 0x93b   :  { %v597_v25 = vpop.f32.mrb[6].mxu0 }
 0x93c   :  { %v3053_v26 = vadd.f32 %v3450_v18, %v597_v25  ;;  %v2695_v27 = vpop.f32.mrb[7].mxu0 }
 0x93e   :  { %3132 = vtanh.f32 %v3053_v26  ;;  %v2440_v29 = vmul.f32 -1.442695, %v3053_v26 }
 0x940   :  { %3134 = vpow2.f32 %v2440_v29 }
 0x948   :  { %v3133_v28 = vpop.eup %3132 }
 0x949   :  { %611 = vrot.lane.b32.xlu0 %v3133_v28, %s3306_s26  ;;  %v192_v28 = vadd.f32 %v3450_v18, %v191_v22  ;;  %v1312_v22 = vld [vmem:[#allocation4] sm:$0xff] }
 0x94a   :  { %v3135_v30 = vpop.eup %3134 }
 0x94b   :  { %v605_v31 = vadd.f32 1.0, %v3135_v30 }
 0x94d   :  { %3136 = vrcp.f32 %v605_v31 }
 0x957   :  { %v3137_v32 = vpop.eup %3136 }
 0x958   :  { %v609_v35 = vmul.f32 %v3137_v32, %v516_v19 }
 0x9bb   :  { %v612_v33 = vpop.permute.xlu0 %611 }
 0x9bc   :  { %v614_v34 = vmul.f32 %v3137_v32, %v612_v33 }
 0x9be   :  { %616 = vrot.lane.b32.xlu1 %v614_v34, %s3306_s26 }
 0xa30   :  { %v617_v36 = vpop.permute.xlu1 %616 }
 0xa31   :  { %v619_v37 = vadd.f32 %v617_v36, %v609_v35 }
 0xa33   :  { %3138 = vtanh.f32 %v619_v37 }
 0xa3d   :  { %v3139_v38 = vpop.eup %3138 }
 0xa3e   :  { %622 = vrot.lane.b32.xlu0 %v3139_v38, %s3306_s26 }
 0xab0   :  { %v623_v41 = vpop.permute.xlu0 %622 }
 0xab1   :  { %v625_v42 = vmul.f32 %v3137_v32, %v623_v41 }
 0xab3   :  { %627 = vrot.lane.b32.xlu1 %v625_v42, %s3307_s2 }
 0xb25   :  { %v628_v43 = vpop.permute.xlu1 %627 }
 0xb26   :  { %630 = vst.msk [vmem:[#allocation2 + $0x18] sm:$0xff] %vm67_vm1, %v628_v43  ;;  %2705 = vmatmul.mubr.msk.f32.vlgmr.msra.gmra.mrb[8].mxu0 %vm67_vm1, %v628_v43  ;;  %v196_v43 = vpop.f32.mrb[6].mxu1 }
 0xb27   :  { %2958 = vmatpush3.bf16.msra.mxu0 %v3403_v11  ;;  %2715 = vmatprep.mubr.msk.f32.mxu0 %vm3304_vm0, %v3305_v1 }
 0xb28   :  { %2959 = vmatprep.subr.bf16.mxu0 %v3303_v0 }
 0xb2b   :  { %2961 = vmatpush3.bf16.msra.mxu0 %v3420_v15 }
 0xb2c   :  { %2962 = vmatprep.subr.bf16.mxu0 %v3303_v0 }
 0xb2d   :  { %v1149_v44 = vld [vmem:[#allocation2 + $0x18] sm:$0xff] }
 0xb2e   :  { %2769 = vmatmul.mubr.msk.f32.gmra.mrb[16].mxu1 %vm67_vm1, %v1149_v44  ;;  %v2648_v44 = vpop.f32.mrb[7].mxu1 }
 0xb2f   :  { %2771 = vmatprep.mubr.msk.f32.mxu1 %vm3304_vm0, %v3305_v1 }
 0xbf9   :  { %v700_v46 = vpop.f32.mrb[8].mxu0 }
 0xbfa   :  { %v704_v47 = vadd.f32 %v700_v46, %v182_v45  ;;  %v2706_v48 = vpop.f32.mrb[9].mxu0 }
 0xbfc   :  { %3140 = vtanh.f32 %v704_v47  ;;  %v2442_v50 = vmul.f32 -1.442695, %v704_v47 }
 0xbfe   :  { %3142 = vpow2.f32 %v2442_v50 }
 0xc06   :  { %v3141_v49 = vpop.eup %3140 }
 0xc07   :  { %714 = vrot.lane.b32.xlu0 %v3141_v49, %s3306_s26  ;;  %v197_v49 = vadd.f32 %v3450_v18, %v196_v43 }
 0xc08   :  { %v3143_v51 = vpop.eup %3142 }
 0xc09   :  { %v708_v52 = vadd.f32 1.0, %v3143_v51 }
 0xc0b   :  { %3144 = vrcp.f32 %v708_v52 }
 0xc15   :  { %v3145_v53 = vpop.eup %3144 }
 0xc16   :  { %v712_v56 = vmul.f32 %v3145_v53, %v619_v37 }
 0xc79   :  { %v715_v54 = vpop.permute.xlu0 %714 }
 0xc7a   :  { %v717_v55 = vmul.f32 %v3145_v53, %v715_v54 }
 0xc7c   :  { %719 = vrot.lane.b32.xlu1 %v717_v55, %s3306_s26 }
 0xcee   :  { %v720_v57 = vpop.permute.xlu1 %719 }
 0xcef   :  { %v722_v58 = vadd.f32 %v720_v57, %v712_v56 }
 0xcf1   :  { %3146 = vtanh.f32 %v722_v58 }
 0xcfb   :  { %v3147_v59 = vpop.eup %3146 }
 0xcfc   :  { %725 = vrot.lane.b32.xlu0 %v3147_v59, %s3306_s26 }
 0xd6e   :  { %v726_v62 = vpop.permute.xlu0 %725 }
 0xd6f   :  { %v728_v63 = vmul.f32 %v3145_v53, %v726_v62  ;;  %v201_v62 = vpop.f32.mrb[8].mxu1 }
 0xd71   :  { %730 = vrot.lane.b32.xlu1 %v728_v63, %s3307_s2  ;;  %v2651_v63 = vpop.f32.mrb[9].mxu1 }
 0xde3   :  { %v731_v2 = vpop.permute.xlu1 %730 }
 0xde4   :  { %733 = vst.msk [vmem:[#allocation2 + $0x20] sm:$0xff] %vm67_vm1, %v731_v2  ;;  %2716 = vmatmul.mubr.msk.f32.vlgmr.msra.gmra.mrb[10].mxu0 %vm67_vm1, %v731_v2 }
 0xde5   :  { %2964 = vmatpush3.bf16.msra.mxu0 %v3403_v11  ;;  %2726 = vmatprep.mubr.msk.f32.mxu0 %vm3304_vm0, %v3305_v1 }
 0xde6   :  { %2965 = vmatprep.subr.bf16.mxu0 %v3303_v0 }
 0xde9   :  { %2967 = vmatpush3.bf16.msra.mxu0 %v3420_v15 }
 0xdea   :  { %2968 = vmatprep.subr.bf16.mxu0 %v3303_v0 }
 0xdeb   :  { %v1150_v3 = vld [vmem:[#allocation2 + $0x20] sm:$0xff] }
 0xdec   :  { %2772 = vmatmul.mubr.msk.f32.gmra.mrb[18].mxu1 %vm67_vm1, %v1150_v3 }
 0xded   :  { %2774 = vmatprep.mubr.msk.f32.mxu1 %vm3304_vm0, %v3305_v1 }
 0xeb7   :  { %v803_v5 = vpop.f32.mrb[10].mxu0 }
 0xeb8   :  { %v807_v6 = vadd.f32 %v803_v5, %v187_v4  ;;  %v2717_v7 = vpop.f32.mrb[11].mxu0 }
 0xeba   :  { %3148 = vtanh.f32 %v807_v6  ;;  %v2444_v9 = vmul.f32 -1.442695, %v807_v6  ;;  %v202_v6 = vadd.f32 %v3450_v18, %v201_v62 }
 0xebc   :  { %3150 = vpow2.f32 %v2444_v9 }
 0xec4   :  { %v3149_v8 = vpop.eup %3148 }
 0xec5   :  { %817 = vrot.lane.b32.xlu0 %v3149_v8, %s3306_s26 }
 0xec6   :  { %v3151_v10 = vpop.eup %3150 }
 0xec7   :  { %v811_v12 = vadd.f32 1.0, %v3151_v10 }
 0xec9   :  { %3152 = vrcp.f32 %v811_v12 }
 0xed3   :  { %v3153_v13 = vpop.eup %3152 }
 0xed4   :  { %v815_v17 = vmul.f32 %v3153_v13, %v722_v58 }
 0xf37   :  { %v818_v14 = vpop.permute.xlu0 %817 }
 0xf38   :  { %v820_v16 = vmul.f32 %v3153_v13, %v818_v14 }
 0xf3a   :  { %822 = vrot.lane.b32.xlu1 %v820_v16, %s3306_s26 }
 0xfac   :  { %v823_v19 = vpop.permute.xlu1 %822 }
 0xfad   :  { %v825_v20 = vadd.f32 %v823_v19, %v815_v17 }
 0xfaf   :  { %3154 = vtanh.f32 %v825_v20 }
 0xfb9   :  { %v3155_v21 = vpop.eup %3154 }
 0xfba   :  { %828 = vrot.lane.b32.xlu0 %v3155_v21, %s3306_s26 }
0x102c   :  { %v829_v24 = vpop.permute.xlu0 %828 }
0x102d   :  { %v831_v25 = vmul.f32 %v3153_v13, %v829_v24  ;;  %v1314_v24 = vld [vmem:[#allocation4 + $0x10] sm:$0xff] }
0x102f   :  { %833 = vrot.lane.b32.xlu1 %v831_v25, %s3307_s2  ;;  %v3623_v25 = vpack.c.bf16 %v1313_v23, %v1312_v22 }
0x1031   :  { %2988 = vmatpush3.bf16.msra.mxu1 %v3623_v25 }
0x1032   :  { %2989 = vmatprep.subr.bf16.mxu1 %v3303_v0 }
0x10a1   :  { %v834_v26 = vpop.permute.xlu1 %833 }
0x10a2   :  { %836 = vst.msk [vmem:[#allocation2 + $0x28] sm:$0xff] %vm67_vm1, %v834_v26  ;;  %2727 = vmatmul.mubr.msk.f32.vlgmr.msra.gmra.mrb[12].mxu0 %vm67_vm1, %v834_v26  ;;  %v1315_v26 = vld [vmem:[#allocation4 + $0x18] sm:$0xff] }
0x10a3   :  { %2970 = vmatpush3.bf16.msra.mxu0 %v3403_v11  ;;  %2737 = vmatprep.mubr.msk.f32.mxu0 %vm3304_vm0, %v3305_v1 }
0x10a4   :  { %2971 = vmatprep.subr.bf16.mxu0 %v3303_v0 }
0x10a7   :  { %2973 = vmatpush3.bf16.msra.mxu0 %v3420_v15 }
0x10a8   :  { %2974 = vmatprep.subr.bf16.mxu0 %v3303_v0 }
0x10a9   :  { %v1151_v27 = vld [vmem:[#allocation2 + $0x28] sm:$0xff] }
0x10aa   :  { %2775 = vmatmul.mubr.msk.f32.gmra.mrb[20].mxu1 %vm67_vm1, %v1151_v27  ;;  %v3626_v27 = vpack.c.bf16 %v1315_v26, %v1314_v24 }
0x10ab   :  { %2777 = vmatprep.mubr.msk.f32.mxu1 %vm3304_vm0, %v3305_v1 }
0x10ac   :  { %2991 = vmatpush3.bf16.msra.mxu1 %v3626_v27 }
0x10ad   :  { %2992 = vmatprep.subr.bf16.mxu1 %v3303_v0 }
0x1175   :  { %v906_v29 = vpop.f32.mrb[12].mxu0 }
0x1176   :  { %v910_v30 = vadd.f32 %v906_v29, %v192_v28  ;;  %v2728_v31 = vpop.f32.mrb[13].mxu0 }
0x1178   :  { %3156 = vtanh.f32 %v910_v30  ;;  %v2446_v33 = vmul.f32 -1.442695, %v910_v30 }
0x117a   :  { %3158 = vpow2.f32 %v2446_v33  ;;  %v3647_v33 = vld [vmem:[%s3825_s6] ss:$0 sm:$0xff] }
0x1182   :  { %v3157_v32 = vpop.eup %3156 }
0x1183   :  { %920 = vrot.lane.b32.xlu0 %v3157_v32, %s3306_s26 }
0x1184   :  { %v3159_v34 = vpop.eup %3158 }
0x1185   :  { %v914_v35 = vadd.f32 1.0, %v3159_v34 }
0x1187   :  { %3160 = vrcp.f32 %v914_v35 }
0x1191   :  { %v3161_v36 = vpop.eup %3160 }
0x1192   :  { %v918_v39 = vmul.f32 %v3161_v36, %v825_v20 }
0x11f5   :  { %v921_v37 = vpop.permute.xlu0 %920 }
0x11f6   :  { %v923_v38 = vmul.f32 %v3161_v36, %v921_v37 }
0x11f8   :  { %925 = vrot.lane.b32.xlu1 %v923_v38, %s3306_s26 }
0x126a   :  { %v926_v40 = vpop.permute.xlu1 %925 }
0x126b   :  { %v928_v41 = vadd.f32 %v926_v40, %v918_v39 }
0x126d   :  { %3162 = vtanh.f32 %v928_v41 }
0x1277   :  { %v3163_v42 = vpop.eup %3162 }
0x1278   :  { %931 = vrot.lane.b32.xlu0 %v3163_v42, %s3306_s26 }
0x12ea   :  { %v932_v45 = vpop.permute.xlu0 %931 }
0x12eb   :  { %v934_v46 = vmul.f32 %v3161_v36, %v932_v45 }
0x12ed   :  { %936 = vrot.lane.b32.xlu1 %v934_v46, %s3307_s2 }
0x135f   :  { %v937_v47 = vpop.permute.xlu1 %936 }
0x1360   :  { %939 = vst.msk [vmem:[#allocation2 + $0x30] sm:$0xff] %vm67_vm1, %v937_v47  ;;  %2738 = vmatmul.mubr.msk.f32.vlgmr.msra.gmra.mrb[14].mxu0 %vm67_vm1, %v937_v47 }
0x1361   :  { %2976 = vmatpush3.bf16.msra.mxu0 %v3403_v11  ;;  %2748 = vmatprep.mubr.msk.f32.mxu0 %vm3304_vm0, %v3305_v1 }
0x1362   :  { %2977 = vmatprep.subr.bf16.mxu0 %v3303_v0 }
0x1365   :  { %2979 = vmatpush3.bf16.msra.mxu0 %v3420_v15 }
0x1366   :  { %3040 = vmatprep.subr.bf16.mxu0 %v3303_v0 }
0x1367   :  { %v1152_v48 = vld [vmem:[#allocation2 + $0x30] sm:$0xff] }
0x1368   :  { %2778 = vmatmul.mubr.msk.f32.gmra.mrb[22].mxu1 %vm67_vm1, %v1152_v48  ;;  %v2250_v48 = vld [vmem:[%s3826_s7] sm:$0xff] }
0x1369   :  { %2780 = vmatprep.mubr.msk.f32.mxu1 %vm3304_vm0, %v3305_v1 }
0x1433   :  { %v1009_v50 = vpop.f32.mrb[14].mxu0 }
0x1434   :  { %v1013_v51 = vadd.f32 %v1009_v50, %v197_v49  ;;  %v2739_v11 = vpop.f32.mrb[15].mxu0  ;;  %v2251_v49 = vld [vmem:[%s3826_s7 + $0x8] sm:$0xff] }
0x1435   :  { %v3041_v50 = vpack.c.bf16 %v2251_v49, %v2250_v48  ;;  %v2253_v11 = vld [vmem:[%s3826_s7 + $0x18] sm:$0xff] }
0x1436   :  { %3164 = vtanh.f32 %v1013_v51  ;;  %v2448_v53 = vmul.f32 -1.442695, %v1013_v51  ;;  %v2252_v51 = vld [vmem:[%s3826_s7 + $0x10] sm:$0xff] }
0x1438   :  { %3166 = vpow2.f32 %v2448_v53 }
0x1440   :  { %v3165_v52 = vpop.eup %3164 }
0x1441   :  { %1023 = vrot.lane.b32.xlu0 %v3165_v52, %s3306_s26  ;;  %v3044_v52 = vpack.c.bf16 %v2253_v11, %v2252_v51 }
0x1442   :  { %v3167_v15 = vpop.eup %3166 }
0x1443   :  { %v1017_v54 = vadd.f32 1.0, %v3167_v15 }
0x1445   :  { %3168 = vrcp.f32 %v1017_v54 }
0x144f   :  { %v3169_v55 = vpop.eup %3168 }
0x1450   :  { %v1021_v58 = vmul.f32 %v3169_v55, %v928_v41 }
0x14b3   :  { %v1024_v56 = vpop.permute.xlu0 %1023 }
0x14b4   :  { %v1026_v57 = vmul.f32 %v3169_v55, %v1024_v56 }
0x14b6   :  { %1028 = vrot.lane.b32.xlu1 %v1026_v57, %s3306_s26 }
0x1528   :  { %v1029_v59 = vpop.permute.xlu1 %1028 }
0x1529   :  { %v1031_v60 = vadd.f32 %v1029_v59, %v1021_v58  ;;  %v3682_v59 = vld [vmem:[%s3827_s8] ss:$0 sm:$0xff]  ;;  %s3308_s8 = smov [#allocation7]  }
0x152a   :  { %s2412_s10 = sshll.u32 %s3308_s8, 4  ;;  %s2413_s10 = int_to_ptr.vmem [resolvable:$true] %s2412_s10 }
0x152b   :  { %3170 = vtanh.f32 %v1031_v60  ;;  %s3274_s11 = scalar_lea.vmem %s2413_s10, 1152  ;;  %p3279_p9 = scmp.lt.s32.totalorder %s2413_s10, %s2413_s10 }
0x152c   :  { %p3275_p8 = scmp.ne.s32.totalorder %s2413_s10, %s3274_s11  ;;  %p3280_p10 = scmp.lt.s32.totalorder %s3274_s11, %s3274_s11 }
0x152e   :  { %p3281_p11 = por %p3280_p10, %p3279_p9 }
0x1530   :  { %p3282_p12 = pnand %p3281_p11, %p3275_p8 }
0x1535   :  { %v3171_v61 = vpop.eup %3170 }
0x1536   :  { %1034 = vrot.lane.b32.xlu0 %v3171_v61, %s3306_s26 }
0x15a8   :  { %v1035_v2 = vpop.permute.xlu0 %1034 }
0x15a9   :  { %v1037_v3 = vmul.f32 %v3169_v55, %v1035_v2 }
0x15ab   :  { %1039 = vrot.lane.b32.xlu1 %v1037_v3, %s3307_s2 }
0x161d   :  { %v1040_v4 = vpop.permute.xlu1 %1039 }
0x161e   :  { %1042 = vst.msk [vmem:[#allocation2 + $0x38] sm:$0xff] %vm67_vm1, %v1040_v4  ;;  %2749 = vmatmul.mubr.msk.f32.vlgmr.msra.gmra.mrb[16].mxu0 %vm67_vm1, %v1040_v4 }
0x161f   :  { %2893 = vmatprep.mubr.msk.f32.mxu0 %vm3304_vm0, %v3305_v1  ;;  %3042 = vmatpush3.bf16.msra.mxu0 %v3041_v50 }
0x1620   :  { %3043 = vmatprep.subr.bf16.mxu0 %v3303_v0 }
0x1623   :  { %3045 = vmatpush3.bf16.msra.mxu0 %v3044_v52 }
0x1625   :  { %v1153_v5 = vld [vmem:[#allocation2 + $0x38] sm:$0xff] }
0x1626   :  { %2781 = vmatmul.mubr.msk.f32.gmra.mrb[24].mxu1 %vm67_vm1, %v1153_v5 }
0x1627   :  { %2783 = vmatprep.mubr.msk.f32.mxu1 %vm3304_vm0, %v3305_v1 }
0x16f1   :  { %v1112_v7 = vpop.f32.mrb[16].mxu0 }
0x16f2   :  { %v1116_v8 = vadd.f32 %v1112_v7, %v202_v6  ;;  %v2750_v9 = vpop.f32.mrb[17].mxu0 }
0x16f4   :  { %3172 = vtanh.f32 %v1116_v8  ;;  %v2450_v12 = vmul.f32 -1.442695, %v1116_v8 }
0x16f6   :  { %3174 = vpow2.f32 %v2450_v12 }
0x16fe   :  { %v3173_v10 = vpop.eup %3172 }
0x16ff   :  { %1126 = vrot.lane.b32.xlu0 %v3173_v10, %s3306_s26 }
0x1700   :  { %v3175_v13 = vpop.eup %3174 }
0x1701   :  { %v1120_v14 = vadd.f32 1.0, %v3175_v13 }
0x1703   :  { %3176 = vrcp.f32 %v1120_v14 }
0x170d   :  { %v3177_v16 = vpop.eup %3176 }
0x170e   :  { %v1124_v20 = vmul.f32 %v3177_v16, %v1031_v60 }
0x1771   :  { %v1127_v17 = vpop.permute.xlu0 %1126 }
0x1772   :  { %v1129_v19 = vmul.f32 %v3177_v16, %v1127_v17 }
0x1774   :  { %1131 = vrot.lane.b32.xlu1 %v1129_v19, %s3306_s26 }
0x17e6   :  { %v1132_v21 = vpop.permute.xlu1 %1131 }
0x17e7   :  { %v1134_v18 = vadd.f32 %v1132_v21, %v1124_v20 }
0x17e9   :  { %3178 = vtanh.f32 %v1134_v18 }
0x17f3   :  { %v3179_v28 = vpop.eup %3178 }
0x17f4   :  { %1137 = vrot.lane.b32.xlu0 %v3179_v28, %s3306_s26 }
0x1866   :  { %v1138_v29 = vpop.permute.xlu0 %1137 }
0x1867   :  { %v1140_v30 = vmul.f32 %v3177_v16, %v1138_v29 }
0x1869   :  { %1142 = vrot.lane.b32.xlu1 %v1140_v30, %s3307_s2 }
0x18db   :  { %v1143_v31 = vpop.permute.xlu1 %1142 }
0x18dc   :  { %1145 = vst.msk [vmem:[#allocation2 + $0x40] sm:$0xff] %vm67_vm1, %v1143_v31 }
0x18e3   :  { %v1154_v32 = vld [vmem:[#allocation2 + $0x40] sm:$0xff] }
0x18e4   :  { %2784 = vmatmul.mubr.msk.f32.gmra.mrb[26].mxu1 %vm67_vm1, %v1154_v32 }
0x18e5   :  { %2794 = vmatprep.mubr.msk.f32.mxu1 %vm3304_vm0, %v3305_v1 }
0x18e8   :  { %2795 = vmatmul.mubr.f32.vlgmr.msra.gmra.mrb[10].mxu1 %v3305_v1 }
0x18e9   :  { %2994 = vmatpush3.bf16.msra.mxu1 %v3623_v25  ;;  %2805 = vmatprep.mubr.msk.f32.mxu1 %vm3304_vm0, %v3305_v1 }
0x18ea   :  { %2995 = vmatprep.subr.bf16.mxu1 %v3303_v0 }
0x18ed   :  { %2997 = vmatpush3.bf16.msra.mxu1 %v3626_v27 }
0x18ee   :  { %2998 = vmatprep.subr.bf16.mxu1 %v3303_v0 }
0x19bb   :  { %v1383_v34 = vpop.f32.mrb[10].mxu1 }
0x19bc   :  { %v3064_v35 = vadd.f32 %v3647_v33, %v1383_v34  ;;  %v2796_v36 = vpop.f32.mrb[11].mxu1 }
0x19be   :  { %3180 = vtanh.f32 %v3064_v35  ;;  %v2461_v38 = vmul.f32 -1.442695, %v3064_v35 }
0x19c0   :  { %3182 = vpow2.f32 %v2461_v38 }
0x19c8   :  { %v3181_v37 = vpop.eup %3180 }
0x19c9   :  { %1397 = vrot.lane.b32.xlu0 %v3181_v37, %s3306_s26 }
0x19ca   :  { %v3183_v39 = vpop.eup %3182 }
0x19cb   :  { %v1391_v40 = vadd.f32 1.0, %v3183_v39 }
0x19cd   :  { %3184 = vrcp.f32 %v1391_v40 }
0x19d7   :  { %v3185_v41 = vpop.eup %3184 }
0x19d8   :  { %v1395_v44 = vmul.f32 0.0, %v3185_v41 }
0x1a3b   :  { %v1398_v42 = vpop.permute.xlu0 %1397 }
0x1a3c   :  { %v1400_v43 = vmul.f32 %v3185_v41, %v1398_v42 }
0x1a3e   :  { %1402 = vrot.lane.b32.xlu1 %v1400_v43, %s3306_s26 }
0x1ab0   :  { %v1403_v45 = vpop.permute.xlu1 %1402 }
0x1ab1   :  { %v1405_v46 = vadd.f32 %v1403_v45, %v1395_v44 }
0x1ab3   :  { %3186 = vtanh.f32 %v1405_v46 }
0x1abd   :  { %v3187_v47 = vpop.eup %3186 }
0x1abe   :  { %1408 = vrot.lane.b32.xlu0 %v3187_v47, %s3306_s26 }
0x1b30   :  { %v1409_v53 = vpop.permute.xlu0 %1408 }
0x1b31   :  { %v1411_v15 = vmul.f32 %v3185_v41, %v1409_v53 }
0x1b33   :  { %1413 = vrot.lane.b32.xlu1 %v1411_v15, %s3307_s2 }
0x1ba5   :  { %v1414_v54 = vpop.permute.xlu1 %1413 }
0x1ba6   :  { %1416 = vst.msk [vmem:[#allocation2] sm:$0xff] %vm67_vm1, %v1414_v54  ;;  %2806 = vmatmul.mubr.msk.f32.vlgmr.msra.gmra.mrb[12].mxu1 %vm67_vm1, %v1414_v54 }
0x1ba7   :  { %3000 = vmatpush3.bf16.msra.mxu1 %v3623_v25  ;;  %2816 = vmatprep.mubr.msk.f32.mxu1 %vm3304_vm0, %v3305_v1 }
0x1ba8   :  { %3001 = vmatprep.subr.bf16.mxu1 %v3303_v0 }
0x1bab   :  { %3003 = vmatpush3.bf16.msra.mxu1 %v3626_v27 }
0x1bac   :  { %3004 = vmatprep.subr.bf16.mxu1 %v3303_v0 }
0x1bad   :  { %v2241_v55 = vld [vmem:[#allocation2] sm:$0xff] }
0x1bae   :  { %2894 = vmatmul.mubr.msk.f32.vlgmr.msra.gmra.mrb[18].mxu0 %vm67_vm1, %v2241_v55 }
0x1baf   :  { %2896 = vmatprep.mubr.msk.f32.mxu0 %vm3304_vm0, %v3305_v1 }
0x1c79   :  { %v1486_v56 = vpop.f32.mrb[12].mxu1 }
0x1c7a   :  { %v3065_v57 = vadd.f32 %v3647_v33, %v1486_v56  ;;  %v2807_v58 = vpop.f32.mrb[13].mxu1 }
0x1c7c   :  { %3188 = vtanh.f32 %v3065_v57  ;;  %v2463_v2 = vmul.f32 -1.442695, %v3065_v57 }
0x1c7e   :  { %3190 = vpow2.f32 %v2463_v2 }
0x1c81   :  { %v2354_v60 = vpop.f32.mrb[18].mxu0 }
0x1c82   :  { %v2355_v61 = vadd.f32 %v3682_v59, %v2354_v60  ;;  %v2895_v62 = vpop.f32.mrb[19].mxu0 }
0x1c84   :  { %2398 = vst [vmem:[#allocation7] sm:$0xff] %v2355_v61 }
0x1c86   :  { %v3189_v63 = vpop.eup %3188 }
0x1c87   :  { %1500 = vrot.lane.b32.xlu0 %v3189_v63, %s3306_s26 }
0x1c88   :  { %v3191_v3 = vpop.eup %3190 }
0x1c89   :  { %v1494_v4 = vadd.f32 1.0, %v3191_v3 }
0x1c8b   :  { %3192 = vrcp.f32 %v1494_v4 }
0x1c95   :  { %v3193_v5 = vpop.eup %3192 }
0x1c96   :  { %v1498_v8 = vmul.f32 %v3193_v5, %v1405_v46 }
0x1cf9   :  { %v1501_v6 = vpop.permute.xlu0 %1500 }
0x1cfa   :  { %v1503_v7 = vmul.f32 %v3193_v5, %v1501_v6 }
0x1cfc   :  { %1505 = vrot.lane.b32.xlu1 %v1503_v7, %s3306_s26 }
0x1d6e   :  { %v1506_v9 = vpop.permute.xlu1 %1505 }
0x1d6f   :  { %v1508_v10 = vadd.f32 %v1506_v9, %v1498_v8 }
0x1d71   :  { %3194 = vtanh.f32 %v1508_v10 }
0x1d7b   :  { %v3195_v12 = vpop.eup %3194 }
0x1d7c   :  { %1511 = vrot.lane.b32.xlu0 %v3195_v12, %s3306_s26 }
0x1dee   :  { %v1512_v13 = vpop.permute.xlu0 %1511 }
0x1def   :  { %v1514_v14 = vmul.f32 %v3193_v5, %v1512_v13 }
0x1df1   :  { %1516 = vrot.lane.b32.xlu1 %v1514_v14, %s3307_s2 }
0x1e63   :  { %v1517_v16 = vpop.permute.xlu1 %1516 }
0x1e64   :  { %1519 = vst.msk [vmem:[#allocation2 + $0x8] sm:$0xff] %vm67_vm1, %v1517_v16  ;;  %2817 = vmatmul.mubr.msk.f32.vlgmr.msra.gmra.mrb[14].mxu1 %vm67_vm1, %v1517_v16 }
0x1e65   :  { %3006 = vmatpush3.bf16.msra.mxu1 %v3623_v25  ;;  %2827 = vmatprep.mubr.msk.f32.mxu1 %vm3304_vm0, %v3305_v1 }
0x1e66   :  { %3007 = vmatprep.subr.bf16.mxu1 %v3303_v0 }
0x1e69   :  { %3009 = vmatpush3.bf16.msra.mxu1 %v3626_v27 }
0x1e6a   :  { %3010 = vmatprep.subr.bf16.mxu1 %v3303_v0 }
0x1e6b   :  { %v2242_v17 = vld [vmem:[#allocation2 + $0x8] sm:$0xff] }
0x1e6c   :  { %2897 = vmatmul.mubr.msk.f32.gmra.mrb[20].mxu0 %vm67_vm1, %v2242_v17 }
0x1e6d   :  { %2899 = vmatprep.mubr.msk.f32.mxu0 %vm3304_vm0, %v3305_v1 }
0x1f37   :  { %v1589_v19 = vpop.f32.mrb[14].mxu1 }
0x1f38   :  { %v3066_v20 = vadd.f32 %v3647_v33, %v1589_v19  ;;  %v2818_v21 = vpop.f32.mrb[15].mxu1 }
0x1f3a   :  { %3196 = vtanh.f32 %v3066_v20  ;;  %v2465_v26 = vmul.f32 -1.442695, %v3066_v20 }
0x1f3c   :  { %3198 = vpow2.f32 %v2465_v26 }
0x1f3f   :  { %v2359_v18 = vpop.f32.mrb[20].mxu0 }
0x1f40   :  { %v2360_v22 = vadd.f32 %v3682_v59, %v2359_v18  ;;  %v2898_v23 = vpop.f32.mrb[21].mxu0 }
0x1f42   :  { %2399 = vst [vmem:[#allocation7 + $0x8] sm:$0xff] %v2360_v22 }
0x1f44   :  { %v3197_v24 = vpop.eup %3196 }
0x1f45   :  { %1603 = vrot.lane.b32.xlu0 %v3197_v24, %s3306_s26 }
0x1f46   :  { %v3199_v28 = vpop.eup %3198 }
0x1f47   :  { %v1597_v29 = vadd.f32 1.0, %v3199_v28 }
0x1f49   :  { %3200 = vrcp.f32 %v1597_v29 }
0x1f53   :  { %v3201_v30 = vpop.eup %3200 }
0x1f54   :  { %v1601_v34 = vmul.f32 %v3201_v30, %v1508_v10 }
0x1fb7   :  { %v1604_v31 = vpop.permute.xlu0 %1603 }
0x1fb8   :  { %v1606_v32 = vmul.f32 %v3201_v30, %v1604_v31 }
0x1fba   :  { %1608 = vrot.lane.b32.xlu1 %v1606_v32, %s3306_s26 }
0x202c   :  { %v1609_v35 = vpop.permute.xlu1 %1608 }
0x202d   :  { %v1611_v36 = vadd.f32 %v1609_v35, %v1601_v34 }
0x202f   :  { %3202 = vtanh.f32 %v1611_v36 }
0x2039   :  { %v3203_v37 = vpop.eup %3202 }
0x203a   :  { %1614 = vrot.lane.b32.xlu0 %v3203_v37, %s3306_s26 }
0x20ac   :  { %v1615_v38 = vpop.permute.xlu0 %1614 }
0x20ad   :  { %v1617_v39 = vmul.f32 %v3201_v30, %v1615_v38 }
0x20af   :  { %1619 = vrot.lane.b32.xlu1 %v1617_v39, %s3307_s2 }
0x2121   :  { %v1620_v40 = vpop.permute.xlu1 %1619 }
0x2122   :  { %1622 = vst.msk [vmem:[#allocation2 + $0x10] sm:$0xff] %vm67_vm1, %v1620_v40  ;;  %2828 = vmatmul.mubr.msk.f32.vlgmr.msra.gmra.mrb[16].mxu1 %vm67_vm1, %v1620_v40 }
0x2123   :  { %3012 = vmatpush3.bf16.msra.mxu1 %v3623_v25  ;;  %2838 = vmatprep.mubr.msk.f32.mxu1 %vm3304_vm0, %v3305_v1 }
0x2124   :  { %3013 = vmatprep.subr.bf16.mxu1 %v3303_v0 }
0x2127   :  { %3015 = vmatpush3.bf16.msra.mxu1 %v3626_v27 }
0x2128   :  { %3016 = vmatprep.subr.bf16.mxu1 %v3303_v0 }
0x2129   :  { %v2243_v41 = vld [vmem:[#allocation2 + $0x10] sm:$0xff] }
0x212a   :  { %2900 = vmatmul.mubr.msk.f32.gmra.mrb[22].mxu0 %vm67_vm1, %v2243_v41 }
0x212b   :  { %2902 = vmatprep.mubr.msk.f32.mxu0 %vm3304_vm0, %v3305_v1 }
0x21f5   :  { %v1692_v42 = vpop.f32.mrb[16].mxu1 }
0x21f6   :  { %v3067_v43 = vadd.f32 %v3647_v33, %v1692_v42  ;;  %v2829_v44 = vpop.f32.mrb[17].mxu1 }
0x21f8   :  { %3204 = vtanh.f32 %v3067_v43  ;;  %v2467_v49 = vmul.f32 -1.442695, %v3067_v43 }
0x21fa   :  { %3206 = vpow2.f32 %v2467_v49 }
0x21fd   :  { %v2364_v45 = vpop.f32.mrb[22].mxu0 }
0x21fe   :  { %v2365_v46 = vadd.f32 %v3682_v59, %v2364_v45  ;;  %v2901_v47 = vpop.f32.mrb[23].mxu0 }
0x2200   :  { %2400 = vst [vmem:[#allocation7 + $0x10] sm:$0xff] %v2365_v46 }
0x2202   :  { %v3205_v48 = vpop.eup %3204 }
0x2203   :  { %1706 = vrot.lane.b32.xlu0 %v3205_v48, %s3306_s26 }
0x2204   :  { %v3207_v50 = vpop.eup %3206 }
0x2205   :  { %v1700_v51 = vadd.f32 1.0, %v3207_v50 }
0x2207   :  { %3208 = vrcp.f32 %v1700_v51 }
0x2211   :  { %v3209_v11 = vpop.eup %3208 }
0x2212   :  { %v1704_v15 = vmul.f32 %v3209_v11, %v1611_v36 }
0x2275   :  { %v1707_v52 = vpop.permute.xlu0 %1706 }
0x2276   :  { %v1709_v53 = vmul.f32 %v3209_v11, %v1707_v52 }
0x2278   :  { %1711 = vrot.lane.b32.xlu1 %v1709_v53, %s3306_s26 }
0x22ea   :  { %v1712_v54 = vpop.permute.xlu1 %1711 }
0x22eb   :  { %v1714_v55 = vadd.f32 %v1712_v54, %v1704_v15 }
0x22ed   :  { %3210 = vtanh.f32 %v1714_v55 }
0x22f7   :  { %v3211_v56 = vpop.eup %3210 }
0x22f8   :  { %1717 = vrot.lane.b32.xlu0 %v3211_v56, %s3306_s26 }
0x236a   :  { %v1718_v57 = vpop.permute.xlu0 %1717 }
0x236b   :  { %v1720_v58 = vmul.f32 %v3209_v11, %v1718_v57 }
0x236d   :  { %1722 = vrot.lane.b32.xlu1 %v1720_v58, %s3307_s2 }
0x23df   :  { %v1723_v60 = vpop.permute.xlu1 %1722 }
0x23e0   :  { %1725 = vst.msk [vmem:[#allocation2 + $0x18] sm:$0xff] %vm67_vm1, %v1723_v60  ;;  %2839 = vmatmul.mubr.msk.f32.vlgmr.msra.gmra.mrb[18].mxu1 %vm67_vm1, %v1723_v60 }
0x23e1   :  { %3018 = vmatpush3.bf16.msra.mxu1 %v3623_v25  ;;  %2849 = vmatprep.mubr.msk.f32.mxu1 %vm3304_vm0, %v3305_v1 }
0x23e2   :  { %3019 = vmatprep.subr.bf16.mxu1 %v3303_v0 }
0x23e5   :  { %3021 = vmatpush3.bf16.msra.mxu1 %v3626_v27 }
0x23e6   :  { %3022 = vmatprep.subr.bf16.mxu1 %v3303_v0 }
0x23e7   :  { %v2244_v61 = vld [vmem:[#allocation2 + $0x18] sm:$0xff] }
0x23e8   :  { %2903 = vmatmul.mubr.msk.f32.gmra.mrb[24].mxu0 %vm67_vm1, %v2244_v61 }
0x23e9   :  { %2905 = vmatprep.mubr.msk.f32.mxu0 %vm3304_vm0, %v3305_v1 }
0x24b3   :  { %v1795_v62 = vpop.f32.mrb[18].mxu1 }
0x24b4   :  { %v3068_v63 = vadd.f32 %v3647_v33, %v1795_v62  ;;  %v2840_v2 = vpop.f32.mrb[19].mxu1 }
0x24b6   :  { %3212 = vtanh.f32 %v3068_v63  ;;  %v2469_v7 = vmul.f32 -1.442695, %v3068_v63 }
0x24b8   :  { %3214 = vpow2.f32 %v2469_v7 }
0x24bb   :  { %v2369_v3 = vpop.f32.mrb[24].mxu0 }
0x24bc   :  { %v2370_v4 = vadd.f32 %v3682_v59, %v2369_v3  ;;  %v2904_v5 = vpop.f32.mrb[25].mxu0 }
0x24be   :  { %2401 = vst [vmem:[#allocation7 + $0x18] sm:$0xff] %v2370_v4 }
0x24c0   :  { %v3213_v6 = vpop.eup %3212 }
0x24c1   :  { %1809 = vrot.lane.b32.xlu0 %v3213_v6, %s3306_s26 }
0x24c2   :  { %v3215_v8 = vpop.eup %3214 }
0x24c3   :  { %v1803_v9 = vadd.f32 1.0, %v3215_v8 }
0x24c5   :  { %3216 = vrcp.f32 %v1803_v9 }
0x24cf   :  { %v3217_v10 = vpop.eup %3216 }
0x24d0   :  { %v1807_v14 = vmul.f32 %v3217_v10, %v1714_v55 }
0x2533   :  { %v1810_v12 = vpop.permute.xlu0 %1809 }
0x2534   :  { %v1812_v13 = vmul.f32 %v3217_v10, %v1810_v12 }
0x2536   :  { %1814 = vrot.lane.b32.xlu1 %v1812_v13, %s3306_s26 }
0x25a8   :  { %v1815_v16 = vpop.permute.xlu1 %1814 }
0x25a9   :  { %v1817_v17 = vadd.f32 %v1815_v16, %v1807_v14 }
0x25ab   :  { %3218 = vtanh.f32 %v1817_v17 }
0x25b5   :  { %v3219_v19 = vpop.eup %3218 }
0x25b6   :  { %1820 = vrot.lane.b32.xlu0 %v3219_v19, %s3306_s26 }
0x2628   :  { %v1821_v20 = vpop.permute.xlu0 %1820 }
0x2629   :  { %v1823_v21 = vmul.f32 %v3217_v10, %v1821_v20 }
0x262b   :  { %1825 = vrot.lane.b32.xlu1 %v1823_v21, %s3307_s2 }
0x269d   :  { %v1826_v18 = vpop.permute.xlu1 %1825 }
0x269e   :  { %1828 = vst.msk [vmem:[#allocation2 + $0x20] sm:$0xff] %vm67_vm1, %v1826_v18  ;;  %2850 = vmatmul.mubr.msk.f32.vlgmr.msra.gmra.mrb[20].mxu1 %vm67_vm1, %v1826_v18 }
0x269f   :  { %3024 = vmatpush3.bf16.msra.mxu1 %v3623_v25  ;;  %2860 = vmatprep.mubr.msk.f32.mxu1 %vm3304_vm0, %v3305_v1 }
0x26a0   :  { %3025 = vmatprep.subr.bf16.mxu1 %v3303_v0 }
0x26a3   :  { %3027 = vmatpush3.bf16.msra.mxu1 %v3626_v27 }
0x26a4   :  { %3028 = vmatprep.subr.bf16.mxu1 %v3303_v0 }
0x26a5   :  { %v2245_v22 = vld [vmem:[#allocation2 + $0x20] sm:$0xff] }
0x26a6   :  { %2906 = vmatmul.mubr.msk.f32.gmra.mrb[26].mxu0 %vm67_vm1, %v2245_v22 }
0x26a7   :  { %2908 = vmatprep.mubr.msk.f32.mxu0 %vm3304_vm0, %v3305_v1 }
0x2771   :  { %v1898_v23 = vpop.f32.mrb[20].mxu1 }
0x2772   :  { %v3069_v24 = vadd.f32 %v3647_v33, %v1898_v23  ;;  %v2851_v26 = vpop.f32.mrb[21].mxu1 }
0x2774   :  { %3220 = vtanh.f32 %v3069_v24  ;;  %v2471_v32 = vmul.f32 -1.442695, %v3069_v24 }
0x2776   :  { %3222 = vpow2.f32 %v2471_v32 }
0x2779   :  { %v2374_v28 = vpop.f32.mrb[26].mxu0 }
0x277a   :  { %v2375_v29 = vadd.f32 %v3682_v59, %v2374_v28  ;;  %v2907_v30 = vpop.f32.mrb[27].mxu0 }
0x277c   :  { %2402 = vst [vmem:[#allocation7 + $0x20] sm:$0xff] %v2375_v29 }
0x277e   :  { %v3221_v31 = vpop.eup %3220 }
0x277f   :  { %1912 = vrot.lane.b32.xlu0 %v3221_v31, %s3306_s26 }
0x2780   :  { %v3223_v34 = vpop.eup %3222 }
0x2781   :  { %v1906_v35 = vadd.f32 1.0, %v3223_v34 }
0x2783   :  { %3224 = vrcp.f32 %v1906_v35 }
0x278d   :  { %v3225_v36 = vpop.eup %3224 }
0x278e   :  { %v1910_v39 = vmul.f32 %v3225_v36, %v1817_v17 }
0x27f1   :  { %v1913_v37 = vpop.permute.xlu0 %1912 }
0x27f2   :  { %v1915_v38 = vmul.f32 %v3225_v36, %v1913_v37 }
0x27f4   :  { %1917 = vrot.lane.b32.xlu1 %v1915_v38, %s3306_s26 }
0x2866   :  { %v1918_v40 = vpop.permute.xlu1 %1917 }
0x2867   :  { %v1920_v41 = vadd.f32 %v1918_v40, %v1910_v39 }
0x2869   :  { %3226 = vtanh.f32 %v1920_v41 }
0x2873   :  { %v3227_v42 = vpop.eup %3226 }
0x2874   :  { %1923 = vrot.lane.b32.xlu0 %v3227_v42, %s3306_s26 }
0x28e6   :  { %v1924_v43 = vpop.permute.xlu0 %1923 }
0x28e7   :  { %v1926_v44 = vmul.f32 %v3225_v36, %v1924_v43 }
0x28e9   :  { %1928 = vrot.lane.b32.xlu1 %v1926_v44, %s3307_s2 }
0x295b   :  { %v1929_v45 = vpop.permute.xlu1 %1928 }
0x295c   :  { %1931 = vst.msk [vmem:[#allocation2 + $0x28] sm:$0xff] %vm67_vm1, %v1929_v45  ;;  %2861 = vmatmul.mubr.msk.f32.vlgmr.msra.gmra.mrb[22].mxu1 %vm67_vm1, %v1929_v45 }
0x295d   :  { %3030 = vmatpush3.bf16.msra.mxu1 %v3623_v25  ;;  %2871 = vmatprep.mubr.msk.f32.mxu1 %vm3304_vm0, %v3305_v1 }
0x295e   :  { %3031 = vmatprep.subr.bf16.mxu1 %v3303_v0 }
0x2961   :  { %3033 = vmatpush3.bf16.msra.mxu1 %v3626_v27 }
0x2962   :  { %3034 = vmatprep.subr.bf16.mxu1 %v3303_v0 }
0x2963   :  { %v2246_v46 = vld [vmem:[#allocation2 + $0x28] sm:$0xff] }
0x2964   :  { %2909 = vmatmul.mubr.msk.f32.gmra.mrb[28].mxu0 %vm67_vm1, %v2246_v46 }
0x2965   :  { %2911 = vmatprep.mubr.msk.f32.mxu0 %vm3304_vm0, %v3305_v1 }
0x2a2f   :  { %v2001_v47 = vpop.f32.mrb[22].mxu1 }
0x2a30   :  { %v3070_v48 = vadd.f32 %v3647_v33, %v2001_v47  ;;  %v2862_v49 = vpop.f32.mrb[23].mxu1 }
0x2a32   :  { %3228 = vtanh.f32 %v3070_v48  ;;  %v2473_v53 = vmul.f32 -1.442695, %v3070_v48 }
0x2a34   :  { %3230 = vpow2.f32 %v2473_v53 }
0x2a37   :  { %v2379_v50 = vpop.f32.mrb[28].mxu0 }
0x2a38   :  { %v2380_v51 = vadd.f32 %v3682_v59, %v2379_v50  ;;  %v2910_v11 = vpop.f32.mrb[29].mxu0 }
0x2a3a   :  { %2403 = vst [vmem:[#allocation7 + $0x28] sm:$0xff] %v2380_v51 }
0x2a3c   :  { %v3229_v52 = vpop.eup %3228 }
0x2a3d   :  { %2015 = vrot.lane.b32.xlu0 %v3229_v52, %s3306_s26 }
0x2a3e   :  { %v3231_v15 = vpop.eup %3230 }
0x2a3f   :  { %v2009_v54 = vadd.f32 1.0, %v3231_v15 }
0x2a41   :  { %3232 = vrcp.f32 %v2009_v54 }
0x2a4b   :  { %v3233_v55 = vpop.eup %3232 }
0x2a4c   :  { %v2013_v58 = vmul.f32 %v3233_v55, %v1920_v41 }
0x2aaf   :  { %v2016_v56 = vpop.permute.xlu0 %2015 }
0x2ab0   :  { %v2018_v57 = vmul.f32 %v3233_v55, %v2016_v56 }
0x2ab2   :  { %2020 = vrot.lane.b32.xlu1 %v2018_v57, %s3306_s26 }
0x2b24   :  { %v2021_v60 = vpop.permute.xlu1 %2020 }
0x2b25   :  { %v2023_v61 = vadd.f32 %v2021_v60, %v2013_v58 }
0x2b27   :  { %3234 = vtanh.f32 %v2023_v61 }
0x2b31   :  { %v3235_v62 = vpop.eup %3234 }
0x2b32   :  { %2026 = vrot.lane.b32.xlu0 %v3235_v62, %s3306_s26 }
0x2ba4   :  { %v2027_v63 = vpop.permute.xlu0 %2026 }
0x2ba5   :  { %v2029_v2 = vmul.f32 %v3233_v55, %v2027_v63 }
0x2ba7   :  { %2031 = vrot.lane.b32.xlu1 %v2029_v2, %s3307_s2 }
0x2c19   :  { %v2032_v3 = vpop.permute.xlu1 %2031 }
0x2c1a   :  { %2034 = vst.msk [vmem:[#allocation2 + $0x30] sm:$0xff] %vm67_vm1, %v2032_v3  ;;  %2872 = vmatmul.mubr.msk.f32.vlgmr.msra.gmra.mrb[24].mxu1 %vm67_vm1, %v2032_v3 }
0x2c1b   :  { %3036 = vmatpush3.bf16.msra.mxu1 %v3623_v25  ;;  %2882 = vmatprep.mubr.msk.f32.mxu1 %vm3304_vm0, %v3305_v1 }
0x2c1c   :  { %3037 = vmatprep.subr.bf16.mxu1 %v3303_v0 }
0x2c1f   :  { %3039 = vmatpush3.bf16.msra.mxu1 %v3626_v27 }
0x2c21   :  { %v2247_v4 = vld [vmem:[#allocation2 + $0x30] sm:$0xff] }
0x2c22   :  { %2912 = vmatmul.mubr.msk.f32.gmra.mrb[30].mxu0 %vm67_vm1, %v2247_v4 }
0x2c23   :  { %2914 = vmatprep.mubr.msk.f32.mxu0 %vm3304_vm0, %v3305_v1 }
0x2ced   :  { %v2104_v5 = vpop.f32.mrb[24].mxu1 }
0x2cee   :  { %v3071_v6 = vadd.f32 %v3647_v33, %v2104_v5  ;;  %v2873_v7 = vpop.f32.mrb[25].mxu1 }
0x2cf0   :  { %3236 = vtanh.f32 %v3071_v6  ;;  %v2475_v0 = vmul.f32 -1.442695, %v3071_v6 }
0x2cf2   :  { %3238 = vpow2.f32 %v2475_v0 }
0x2cf5   :  { %v2384_v8 = vpop.f32.mrb[30].mxu0 }
0x2cf6   :  { %v2385_v25 = vadd.f32 %v3682_v59, %v2384_v8  ;;  %v2913_v9 = vpop.f32.mrb[31].mxu0 }
0x2cf8   :  { %2404 = vst [vmem:[#allocation7 + $0x30] sm:$0xff] %v2385_v25 }
0x2cfa   :  { %v3237_v10 = vpop.eup %3236 }
0x2cfb   :  { %2118 = vrot.lane.b32.xlu0 %v3237_v10, %s3306_s26 }
0x2cfc   :  { %v3239_v27 = vpop.eup %3238 }
0x2cfd   :  { %v2112_v12 = vadd.f32 1.0, %v3239_v27 }
0x2cff   :  { %3240 = vrcp.f32 %v2112_v12 }
0x2d09   :  { %v3241_v13 = vpop.eup %3240 }
0x2d0a   :  { %v2116_v17 = vmul.f32 %v3241_v13, %v2023_v61 }
0x2d6d   :  { %v2119_v14 = vpop.permute.xlu0 %2118 }
0x2d6e   :  { %v2121_v16 = vmul.f32 %v3241_v13, %v2119_v14 }
0x2d70   :  { %2123 = vrot.lane.b32.xlu1 %v2121_v16, %s3306_s26 }
0x2de2   :  { %v2124_v19 = vpop.permute.xlu1 %2123 }
0x2de3   :  { %v2126_v20 = vadd.f32 %v2124_v19, %v2116_v17 }
0x2de5   :  { %3242 = vtanh.f32 %v2126_v20 }
0x2def   :  { %v3243_v21 = vpop.eup %3242 }
0x2df0   :  { %2129 = vrot.lane.b32.xlu0 %v3243_v21, %s3306_s26 }
0x2e62   :  { %v2130_v18 = vpop.permute.xlu0 %2129 }
0x2e63   :  { %v2132_v22 = vmul.f32 %v3241_v13, %v2130_v18 }
0x2e65   :  { %2134 = vrot.lane.b32.xlu1 %v2132_v22, %s3307_s2 }
0x2ed7   :  { %v2135_v23 = vpop.permute.xlu1 %2134 }
0x2ed8   :  { %2137 = vst.msk [vmem:[#allocation2 + $0x38] sm:$0xff] %vm67_vm1, %v2135_v23  ;;  %2883 = vmatmul.mubr.msk.f32.vlgmr.msra.gmra.mrb[26].mxu1 %vm67_vm1, %v2135_v23 }
0x2edf   :  { %v2248_v24 = vld [vmem:[#allocation2 + $0x38] sm:$0xff] }
0x2ee0   :  { %2915 = vmatmul.mubr.msk.f32.gmra.mrb[32].mxu0 %vm67_vm1, %v2248_v24 }
0x2ee1   :  { %2917 = vmatprep.mubr.msk.f32.mxu0 %vm3304_vm0, %v3305_v1 }
0x2fab   :  { %v2207_v26 = vpop.f32.mrb[26].mxu1 }
0x2fac   :  { %v3072_v28 = vadd.f32 %v3647_v33, %v2207_v26  ;;  %v2884_v29 = vpop.f32.mrb[27].mxu1 }
0x2fae   :  { %3244 = vtanh.f32 %v3072_v28  ;;  %v2477_v35 = vmul.f32 -1.442695, %v3072_v28 }
0x2fb0   :  { %3246 = vpow2.f32 %v2477_v35 }
0x2fb3   :  { %v2389_v30 = vpop.f32.mrb[32].mxu0 }
0x2fb4   :  { %v2390_v31 = vadd.f32 %v3682_v59, %v2389_v30  ;;  %v2916_v32 = vpop.f32.mrb[33].mxu0 }
0x2fb6   :  { %2405 = vst [vmem:[#allocation7 + $0x38] sm:$0xff] %v2390_v31 }
0x2fb8   :  { %v3245_v34 = vpop.eup %3244 }
0x2fb9   :  { %2221 = vrot.lane.b32.xlu0 %v3245_v34, %s3306_s26 }
0x2fba   :  { %v3247_v36 = vpop.eup %3246 }
0x2fbb   :  { %v2215_v37 = vadd.f32 1.0, %v3247_v36 }
0x2fbd   :  { %3248 = vrcp.f32 %v2215_v37 }
0x2fc7   :  { %v3249_v38 = vpop.eup %3248 }
0x2fc8   :  { %v2219_v33 = vmul.f32 %v3249_v38, %v2126_v20 }
0x302b   :  { %v2222_v1 = vpop.permute.xlu0 %2221 }
0x302c   :  { %v2224_v39 = vmul.f32 %v3249_v38, %v2222_v1 }
0x302e   :  { %2226 = vrot.lane.b32.xlu1 %v2224_v39, %s3306_s26 }
0x30a0   :  { %v2227_v40 = vpop.permute.xlu1 %2226 }
0x30a1   :  { %v2229_v41 = vadd.f32 %v2227_v40, %v2219_v33 }
0x30a3   :  { %3250 = vtanh.f32 %v2229_v41 }
0x30ad   :  { %v3251_v42 = vpop.eup %3250 }
0x30ae   :  { %2232 = vrot.lane.b32.xlu0 %v3251_v42, %s3306_s26 }
0x3120   :  { %v2233_v43 = vpop.permute.xlu0 %2232 }
0x3121   :  { %v2235_v44 = vmul.f32 %v3249_v38, %v2233_v43 }
0x3123   :  { %2237 = vrot.lane.b32.xlu1 %v2235_v44, %s3307_s2 }
0x3195   :  { %v2238_v45 = vpop.permute.xlu1 %2237 }
0x3196   :  { %2240 = vst.msk [vmem:[#allocation2 + $0x40] sm:$0xff] %vm67_vm1, %v2238_v45 }
0x319d   :  { %v2249_v46 = vld [vmem:[#allocation2 + $0x40] sm:$0xff] }
0x319e   :  { %2918 = vmatmul.mubr.msk.f32.gmra.mrb[34].mxu0 %vm67_vm1, %v2249_v46 }
0x3271   :  { %v2394_v47 = vpop.f32.mrb[34].mxu0 }
0x3272   :  { %v2395_v48 = vadd.f32 %v3682_v59, %v2394_v47  ;;  %v2919_v49 = vpop.f32.mrb[35].mxu0 }
0x3274   :  { %2406 = vst [vmem:[#allocation7 + $0x40] sm:$0xff] %v2395_v48 }
0x3275   :  { %3285 = shalt.err (!%p3282_p12)
}
0x3276   :  { %s3286_s13 = scalar_lea.hbm %s3828_s9, 1152 }
0x3277   :  { %p3287_p13 = scmp.ne.s32.totalorder %s3828_s9, %s3286_s13  ;;  %p3290_p0 = scmp.lt.u32.totalorder %s3286_s13, %s3828_s9 }
0x3279   :  { %p3292_p1 = pnand %p3290_p0, %p3287_p13 }
0x327b   :  { %3295 = shalt.err (!%p3292_p1)
}
0x327c   :  { %2418 = dma.vmem_to_hbm [thread:$0]  %s2413_s10, 1152, %s3828_s9, [#allocation6], %s3301_s19, %s3301_s19, %s3302_s20  }
0x327d   :  { %3298 = dma.done.wait [#allocation6], 1152  }
0x327e   :  { %3299 = vsyncadd [#allocation6], 4294966144 }
0x327f   :  { %2422 = vsyncpa [#allocation5], 1 }
0x3280   :  { %2423 = vsyncpa [#allocation6], 1 }

</bundles_post_ra>
